<compile_context>
chip_gen: v7x
topology: tpu7x:2x2x1
jax: 0.10.0
libtpu: 0.0.40
codegen_flags: <defaults>
</compile_context>

<pallas_src>
import functools

import jax
import jax.numpy as jnp
from jax.experimental import pallas as pl

LANE = 128  # lane width of the single lane-dense kernel output slab


def _full_spec(shape):
    # whole-array block, grid=(1,)
    return pl.BlockSpec(shape, lambda i: (0,) * len(shape))


# ----------------------------------------------------------------------------
# One fused kernel: 2-layer BiLSTM encoder + mu/logsigma heads + softmax(theta)
# + KL + beta softmax + decode + reconstruction loss.
# ----------------------------------------------------------------------------
def _fused_etm_kernel(x_ref, bows_ref, rho_t_ref,
                      wih0_ref, whh0_ref, b0_ref,
                      wih1_ref, whh1_ref, b1_ref,
                      wheads_ref, bheads_ref, alphas_ref,
                      out_ref):
    f32 = jnp.float32
    T, V = bows_ref.shape            # LSTM sequence length == number of documents (Bsz)
    TN = x_ref.shape[0]
    N = TN // T                      # LSTM batch == avg_words
    H = whh0_ref.shape[1]            # t_hidden_size
    K = alphas_ref.shape[0]          # num_topics
    Lw = out_ref.shape[1]

    def bilstm_layer(x2d, wih_ref, whh_ref, b_ref):
        # Hoisted input projection: all timesteps, both directions, b_ih + b_hh folded in.
        #   x2d: (T*N, Din), wih: (Din, 8H) cols = [fwd i,f,g,o | bwd i,f,g,o]
        proj = jnp.dot(x2d, wih_ref[...], preferred_element_type=f32) + b_ref[...]
        dir_seqs = []
        for d in range(2):                                    # 0 = forward, 1 = backward
            pre = proj[:, d * 4 * H:(d + 1) * 4 * H]          # (T*N, 4H) lane-aligned slice
            whh_d = whh_ref[d]                                # (H, 4H), gates along lanes
            h = jnp.zeros((N, H), f32)
            c = jnp.zeros((N, H), f32)
            hs = []
            steps = range(T) if d == 0 else range(T - 1, -1, -1)
            for t in steps:                                   # tiny static T -> unrolled
                # single fused recurrent matmul for all 4 gates
                gates = pre[t * N:(t + 1) * N, :] + jnp.dot(
                    h, whh_d, preferred_element_type=f32)     # (N, 4H)
                i_g = jax.nn.sigmoid(gates[:, 0 * H:1 * H])
                f_g = jax.nn.sigmoid(gates[:, 1 * H:2 * H])
                g_g = jnp.tanh(gates[:, 2 * H:3 * H])
                o_g = jax.nn.sigmoid(gates[:, 3 * H:4 * H])
                c = f_g * c + i_g * g_g
                h = o_g * jnp.tanh(c)
                hs.append(h)                                  # stays in vregs
            if d == 1:
                hs = hs[::-1]                                 # time order for backward dir
            dir_seqs.append(jnp.concatenate(hs, axis=0))      # (T*N, H)
        return jnp.concatenate(dir_seqs, axis=1)              # (T*N, 2H)

    # ---- 2-layer bidirectional LSTM (everything in vregs) ----
    h0 = bilstm_layer(x_ref[...], wih0_ref, whh0_ref, b0_ref)   # (T*N, 2H)
    q2d = bilstm_layer(h0, wih1_ref, whh1_ref, b1_ref)          # (T*N, 2H)
    # dropout / t_drop are identity in eval mode

    # ---- heads: [mu | logsigma] in one matmul ----
    hv = jnp.dot(q2d, wheads_ref[...], preferred_element_type=f32) + bheads_ref[...]  # (T*N,2K)
    mu = hv[:, :K]
    ls = hv[:, K:2 * K]

    # theta = softmax(mu, -1)   (eval-mode reparameterize -> z = mu)
    m = jnp.max(mu, axis=-1, keepdims=True)
    e = jnp.exp(mu - m)
    theta = e * pl.reciprocal(jnp.sum(e, axis=-1, keepdims=True), approx=True)  # (T*N, K)

    # kld_theta = mean over (avg_words, bsz) of -0.5*sum(1 + ls - mu^2 - exp(ls), -1)
    kl_rows = -0.5 * jnp.sum(1.0 + ls - mu * mu - jnp.exp(ls), axis=-1, keepdims=True)
    kld = jnp.sum(kl_rows, axis=0, keepdims=True) * (1.0 / (T * N))             # (1, 1)

    # torch.max(theta, dim=0)[0]: max over the avg_words axis, per document (in vregs)
    tmax = jnp.concatenate(
        [jnp.max(theta[t * N:(t + 1) * N, :], axis=0, keepdims=True) for t in range(T)],
        axis=0)                                                                  # (Bsz, K)

    # ---- beta directly in (K, V) layout; softmax over the vocab (lane) axis ----
    logit = jnp.dot(alphas_ref[...], rho_t_ref[...], preferred_element_type=f32)  # (K, V)
    bm = jnp.max(logit, axis=-1, keepdims=True)
    be = jnp.exp(logit - bm)
    beta = be * pl.reciprocal(jnp.sum(be, axis=-1, keepdims=True), approx=True)

    # ---- decode + reconstruction loss ----
    res = jnp.dot(tmax, beta, preferred_element_type=f32)                          # (Bsz, V)
    preds = jnp.log(res + 1e-6)
    recon_rows = -jnp.sum(preds * bows_ref[...], axis=1, keepdims=True)            # (Bsz, 1)

    # single lane-dense output slab: rows 0..Bsz-1 = recon, row Bsz = kld, rest zero
    pieces = [jnp.broadcast_to(recon_rows, (T, Lw)),
              jnp.broadcast_to(kld, (1, Lw))]
    pad_rows = out_ref.shape[0] - T - 1
    if pad_rows > 0:
        pieces.append(jnp.zeros((pad_rows, Lw), f32))
    out_ref[...] = jnp.concatenate(pieces, axis=0)


def _etm_fused_call(x2d, bows, rho_t, wih0, whh0, b0, wih1, whh1, b1,
                    wheads, bheads, alphas_w):
    Bsz = bows.shape[0]
    out_rows = max(8, ((Bsz + 1 + 7) // 8) * 8)      # full (8k, 128) tile -> unmasked store
    args = (x2d, bows, rho_t, wih0, whh0, b0, wih1, whh1, b1, wheads, bheads, alphas_w)
    out = pl.pallas_call(
        _fused_etm_kernel,
        grid=(1,),
        in_specs=[_full_spec(a.shape) for a in args],
        out_specs=_full_spec((out_rows, LANE)),
        out_shape=jax.ShapeDtypeStruct((out_rows, LANE), jnp.float32),
    )(*args)
    return out[:Bsz, 0], out[Bsz, 0]


# ----------------------------------------------------------------------------
# One-time parameter packing (hoisted out of the per-call forward).
# ----------------------------------------------------------------------------
def prepare_params(params):
    def pack_dir(w_ih, w_hh, b_ih, b_hh):
        # w_ih: (4H, Din), w_hh: (4H, H), gate order [i, f, g, o]
        return w_ih.T, w_hh.T, b_ih + b_hh            # (Din,4H), (H,4H), (4H,)

    def pack_layer(layer):
        wf, whf, bf = pack_dir(*layer["fwd"])
        wb, whb, bb = pack_dir(*layer["bwd"])
        wih = jnp.concatenate([wf, wb], axis=1)        # (Din, 8H) = [fwd gates | bwd gates]
        whh = jnp.stack([whf, whb], axis=0)            # (2, H, 4H)
        b = jnp.concatenate([bf, bb], axis=0)[None, :]  # (1, 8H)
        return wih, whh, b

    wih0, whh0, b0 = pack_layer(params["lstm"][0])
    wih1, whh1, b1 = pack_layer(params["lstm"][1])
    return {
        "rho": params["rho"],                                                    # (V, R)
        "rho_t": params["rho"].T,                                                # (R, V)
        "alphas_w": params["alphas_w"],                                          # (K, R)
        "wih0": wih0, "whh0": whh0, "b0": b0,
        "wih1": wih1, "whh1": whh1, "b1": b1,
        "wheads": jnp.concatenate([params["w_mu"].T, params["w_ls"].T], axis=1),  # (2H, 2K)
        "bheads": jnp.concatenate([params["b_mu"], params["b_ls"]], axis=0)[None, :],
    }


# ----------------------------------------------------------------------------
# Full forward pass (matches Model.forward with aggregate=True, eval mode)
# ----------------------------------------------------------------------------
def model_forward(bows, normalized_bows, packed, *, avg_words):
    rho = packed["rho"]                       # (V, R) pretrained embeddings (train_embeddings=False)
    V, R = rho.shape
    Bsz = bows.shape[0]
    A = avg_words

    # ---- encode(): first `avg_words` non-zero vocab positions per doc (data-dependent
    #      gather -> XLA glue; everything downstream is the single fused Pallas kernel) ----
    mask = normalized_bows > 0                # (Bsz, V)
    pos = jnp.arange(V, dtype=jnp.int32)
    keyv = jnp.where(mask, pos, V)
    order = jnp.argsort(keyv, axis=1)[:, :A]  # stable -> nonzero positions in vocab order
    valid = jnp.take_along_axis(mask, order, axis=1)
    word_emb = rho[order] * valid[..., None].astype(jnp.float32)   # (Bsz, A, R)
    # torch feeds the batch_first LSTM (avg_words, bsz, emsize): LSTM batch = A, seq = Bsz.
    x2d = word_emb.reshape(Bsz * A, R)        # time-major (doc, word) rows

    recon_pplx, kld_theta = _etm_fused_call(
        x2d, bows, packed["rho_t"],
        packed["wih0"], packed["whh0"], packed["b0"],
        packed["wih1"], packed["whh1"], packed["b1"],
        packed["wheads"], packed["bheads"], packed["alphas_w"])

    recon_loss = jnp.mean(recon_pplx)         # aggregate=True
    return recon_loss, kld_theta, recon_pplx


# ----------------------------------------------------------------------------
if __name__ == "__main__":
    V, R, H, K = 128, 32, 32, 8          # vocab, rho_size=emsize, t_hidden_size, num_topics
    Bsz, A = 2, 8                        # batch size, avg_words

    root = jax.random.PRNGKey(0)
    ks = jax.random.split(root, 32)

    def nrm(k, shape, scale=0.1):
        return scale * jax.random.normal(k, shape, dtype=jnp.float32)

    def lstm_dir_params(k, din):
        k1, k2, k3, k4 = jax.random.split(k, 4)
        return (nrm(k1, (4 * H, din)), nrm(k2, (4 * H, H)),
                nrm(k3, (4 * H,)), nrm(k4, (4 * H,)))

    params = {
        "rho": nrm(ks[0], (V, R)),                 # pretrained embeddings (rho)
        "alphas_w": nrm(ks[1], (K, R)),            # nn.Linear(rho_size, num_topics).weight
        "w_mu": nrm(ks[2], (K, 2 * H)), "b_mu": nrm(ks[3], (K,)),
        "w_ls": nrm(ks[4], (K, 2 * H)), "b_ls": nrm(ks[5], (K,)),
        "lstm": [
            {"fwd": lstm_dir_params(ks[6], R), "bwd": lstm_dir_params(ks[7], R)},
            {"fwd": lstm_dir_params(ks[8], 2 * H), "bwd": lstm_dir_params(ks[9], 2 * H)},
        ],
    }

    counts = jax.random.randint(ks[10], (Bsz, V), 0, 4).astype(jnp.float32)  # bag-of-words
    totals = jnp.maximum(counts.sum(axis=1, keepdims=True), 1.0)
    bows = counts
    normalized_bows = counts / totals

    packed = jax.block_until_ready(prepare_params(params))   # one-time packing

    fwd = jax.jit(functools.partial(model_forward, avg_words=A))
    recon_loss, kld_theta, recon_pplx = fwd(bows, normalized_bows, packed)
    jax.block_until_ready((recon_loss, kld_theta, recon_pplx))

    assert recon_pplx.shape == (Bsz,)
    assert recon_loss.shape == () and kld_theta.shape == ()
    assert bool(jnp.isfinite(recon_loss)) and bool(jnp.isfinite(kld_theta))
    assert bool(jnp.all(jnp.isfinite(recon_pplx)))
    print("KERNEL_OK")
</pallas_src>

<mosaic_0001>
module attributes {stable_mosaic.version = 11 : i64} {
  func.func @_fused_etm_kernel(%arg0: i32, %arg1: memref<16x32xf32, #tpu.memory_space<vmem>>, %arg2: memref<2x128xf32, #tpu.memory_space<vmem>>, %arg3: memref<32x128xf32, #tpu.memory_space<vmem>>, %arg4: memref<32x256xf32, #tpu.memory_space<vmem>>, %arg5: memref<2x32x128xf32, #tpu.memory_space<vmem>>, %arg6: memref<1x256xf32, #tpu.memory_space<vmem>>, %arg7: memref<64x256xf32, #tpu.memory_space<vmem>>, %arg8: memref<2x32x128xf32, #tpu.memory_space<vmem>>, %arg9: memref<1x256xf32, #tpu.memory_space<vmem>>, %arg10: memref<64x16xf32, #tpu.memory_space<vmem>>, %arg11: memref<1x16xf32, #tpu.memory_space<vmem>>, %arg12: memref<8x32xf32, #tpu.memory_space<vmem>>, %arg13: memref<8x128xf32, #tpu.memory_space<vmem>>) attributes {dimension_semantics = [#tpu.dimension_semantics<arbitrary>], iteration_bounds = array<i64: 1>, scalar_prefetch = 0 : i64, scratch_operands = 0 : i64, tpu.core_type = #tpu.core_type<tc>, window_params = [{pipeline_mode = #tpu.pipeline_mode<synchronous>, transform_indices = @transform_0, window_bounds = array<i64: 16, 32>}, {pipeline_mode = #tpu.pipeline_mode<synchronous>, transform_indices = @transform_1, window_bounds = array<i64: 2, 128>}, {pipeline_mode = #tpu.pipeline_mode<synchronous>, transform_indices = @transform_2, window_bounds = array<i64: 32, 128>}, {pipeline_mode = #tpu.pipeline_mode<synchronous>, transform_indices = @transform_3, window_bounds = array<i64: 32, 256>}, {pipeline_mode = #tpu.pipeline_mode<synchronous>, transform_indices = @transform_4, window_bounds = array<i64: 2, 32, 128>}, {pipeline_mode = #tpu.pipeline_mode<synchronous>, transform_indices = @transform_5, window_bounds = array<i64: 1, 256>}, {pipeline_mode = #tpu.pipeline_mode<synchronous>, transform_indices = @transform_6, window_bounds = array<i64: 64, 256>}, {pipeline_mode = #tpu.pipeline_mode<synchronous>, transform_indices = @transform_7, window_bounds = array<i64: 2, 32, 128>}, {pipeline_mode = #tpu.pipeline_mode<synchronous>, transform_indices = @transform_8, window_bounds = array<i64: 1, 256>}, {pipeline_mode = #tpu.pipeline_mode<synchronous>, transform_indices = @transform_9, window_bounds = array<i64: 64, 16>}, {pipeline_mode = #tpu.pipeline_mode<synchronous>, transform_indices = @transform_10, window_bounds = array<i64: 1, 16>}, {pipeline_mode = #tpu.pipeline_mode<synchronous>, transform_indices = @transform_11, window_bounds = array<i64: 8, 32>}, {pipeline_mode = #tpu.pipeline_mode<synchronous>, transform_indices = @transform_12, window_bounds = array<i64: 8, 128>}]} {
    %c0 = arith.constant 0 : index
    %c0_0 = arith.constant 0 : index
    %0 = vector.load %arg1[%c0, %c0_0] : memref<16x32xf32, #tpu.memory_space<vmem>>, vector<16x32xf32>
    %c0_1 = arith.constant 0 : index
    %c0_2 = arith.constant 0 : index
    %1 = vector.load %arg4[%c0_1, %c0_2] : memref<32x256xf32, #tpu.memory_space<vmem>>, vector<32x256xf32>
    %cst = arith.constant dense<0.000000e+00> : vector<16x256xf32>
    %2 = tpu.matmul %0, %1, %cst {dimension_numbers = #tpu.dot_dimension_numbers<[1], [0], [0], [1], [0, 0, 1, 1], [], []>} : vector<16x32xf32>, vector<32x256xf32>, vector<16x256xf32> -> vector<16x256xf32>
    %c0_3 = arith.constant 0 : index
    %c0_4 = arith.constant 0 : index
    %3 = vector.load %arg6[%c0_3, %c0_4] : memref<1x256xf32, #tpu.memory_space<vmem>>, vector<1x256xf32>
    %4 = vector.broadcast %3 : vector<1x256xf32> to vector<16x256xf32>
    %5 = arith.addf %2, %4 : vector<16x256xf32>
    %6 = vector.extract_strided_slice %5 {offsets = [0, 0], sizes = [16, 128], strides = [1, 1]} : vector<16x256xf32> to vector<16x128xf32>
    %c0_5 = arith.constant 0 : index
    %c0_6 = arith.constant 0 : index
    %c0_7 = arith.constant 0 : index
    %7 = vector.load %arg5[%c0_5, %c0_6, %c0_7] : memref<2x32x128xf32, #tpu.memory_space<vmem>>, vector<1x32x128xf32>
    %8 = vector.shape_cast %7 : vector<1x32x128xf32> to vector<32x128xf32>
    %cst_8 = arith.constant 0.000000e+00 : f32
    %9 = vector.broadcast %cst_8 : f32 to vector<8x32xf32>
    %cst_9 = arith.constant 0.000000e+00 : f32
    %10 = vector.broadcast %cst_9 : f32 to vector<8x32xf32>
    %11 = vector.extract_strided_slice %6 {offsets = [0, 0], sizes = [8, 128], strides = [1, 1]} : vector<16x128xf32> to vector<8x128xf32>
    %cst_10 = arith.constant dense<0.000000e+00> : vector<8x128xf32>
    %12 = tpu.matmul %9, %8, %cst_10 {dimension_numbers = #tpu.dot_dimension_numbers<[1], [0], [0], [1], [0, 0, 1, 1], [], []>} : vector<8x32xf32>, vector<32x128xf32>, vector<8x128xf32> -> vector<8x128xf32>
    %13 = arith.addf %11, %12 : vector<8x128xf32>
    %14 = vector.extract_strided_slice %13 {offsets = [0, 0], sizes = [8, 32], strides = [1, 1]} : vector<8x128xf32> to vector<8x32xf32>
    %15 = arith.negf %14 : vector<8x32xf32>
    %16 = math.exp %15 : vector<8x32xf32>
    %cst_11 = arith.constant 1.000000e+00 : f32
    %17 = vector.broadcast %cst_11 : f32 to vector<8x32xf32>
    %18 = arith.addf %17, %16 : vector<8x32xf32>
    %19 = arith.divf %17, %18 : vector<8x32xf32>
    %20 = vector.extract_strided_slice %13 {offsets = [0, 32], sizes = [8, 32], strides = [1, 1]} : vector<8x128xf32> to vector<8x32xf32>
    %21 = arith.negf %20 : vector<8x32xf32>
    %22 = math.exp %21 : vector<8x32xf32>
    %cst_12 = arith.constant 1.000000e+00 : f32
    %23 = vector.broadcast %cst_12 : f32 to vector<8x32xf32>
    %24 = arith.addf %23, %22 : vector<8x32xf32>
    %25 = arith.divf %23, %24 : vector<8x32xf32>
    %26 = vector.extract_strided_slice %13 {offsets = [0, 64], sizes = [8, 32], strides = [1, 1]} : vector<8x128xf32> to vector<8x32xf32>
    %27 = math.tanh %26 : vector<8x32xf32>
    %28 = vector.extract_strided_slice %13 {offsets = [0, 96], sizes = [8, 32], strides = [1, 1]} : vector<8x128xf32> to vector<8x32xf32>
    %29 = arith.negf %28 : vector<8x32xf32>
    %30 = math.exp %29 : vector<8x32xf32>
    %cst_13 = arith.constant 1.000000e+00 : f32
    %31 = vector.broadcast %cst_13 : f32 to vector<8x32xf32>
    %32 = arith.addf %31, %30 : vector<8x32xf32>
    %33 = arith.divf %31, %32 : vector<8x32xf32>
    %34 = arith.mulf %25, %10 : vector<8x32xf32>
    %35 = arith.mulf %19, %27 : vector<8x32xf32>
    %36 = arith.addf %34, %35 : vector<8x32xf32>
    %37 = math.tanh %36 : vector<8x32xf32>
    %38 = arith.mulf %33, %37 : vector<8x32xf32>
    %39 = vector.extract_strided_slice %6 {offsets = [8, 0], sizes = [8, 128], strides = [1, 1]} : vector<16x128xf32> to vector<8x128xf32>
    %cst_14 = arith.constant dense<0.000000e+00> : vector<8x128xf32>
    %40 = tpu.matmul %38, %8, %cst_14 {dimension_numbers = #tpu.dot_dimension_numbers<[1], [0], [0], [1], [0, 0, 1, 1], [], []>} : vector<8x32xf32>, vector<32x128xf32>, vector<8x128xf32> -> vector<8x128xf32>
    %41 = arith.addf %39, %40 : vector<8x128xf32>
    %42 = vector.extract_strided_slice %41 {offsets = [0, 0], sizes = [8, 32], strides = [1, 1]} : vector<8x128xf32> to vector<8x32xf32>
    %43 = arith.negf %42 : vector<8x32xf32>
    %44 = math.exp %43 : vector<8x32xf32>
    %cst_15 = arith.constant 1.000000e+00 : f32
    %45 = vector.broadcast %cst_15 : f32 to vector<8x32xf32>
    %46 = arith.addf %45, %44 : vector<8x32xf32>
    %47 = arith.divf %45, %46 : vector<8x32xf32>
    %48 = vector.extract_strided_slice %41 {offsets = [0, 32], sizes = [8, 32], strides = [1, 1]} : vector<8x128xf32> to vector<8x32xf32>
    %49 = arith.negf %48 : vector<8x32xf32>
    %50 = math.exp %49 : vector<8x32xf32>
    %cst_16 = arith.constant 1.000000e+00 : f32
    %51 = vector.broadcast %cst_16 : f32 to vector<8x32xf32>
    %52 = arith.addf %51, %50 : vector<8x32xf32>
    %53 = arith.divf %51, %52 : vector<8x32xf32>
    %54 = vector.extract_strided_slice %41 {offsets = [0, 64], sizes = [8, 32], strides = [1, 1]} : vector<8x128xf32> to vector<8x32xf32>
    %55 = math.tanh %54 : vector<8x32xf32>
    %56 = vector.extract_strided_slice %41 {offsets = [0, 96], sizes = [8, 32], strides = [1, 1]} : vector<8x128xf32> to vector<8x32xf32>
    %57 = arith.negf %56 : vector<8x32xf32>
    %58 = math.exp %57 : vector<8x32xf32>
    %cst_17 = arith.constant 1.000000e+00 : f32
    %59 = vector.broadcast %cst_17 : f32 to vector<8x32xf32>
    %60 = arith.addf %59, %58 : vector<8x32xf32>
    %61 = arith.divf %59, %60 : vector<8x32xf32>
    %62 = arith.mulf %53, %36 : vector<8x32xf32>
    %63 = arith.mulf %47, %55 : vector<8x32xf32>
    %64 = arith.addf %62, %63 : vector<8x32xf32>
    %65 = math.tanh %64 : vector<8x32xf32>
    %66 = arith.mulf %61, %65 : vector<8x32xf32>
    %67 = tpu.concatenate %38, %66 in 0 : vector<8x32xf32>, vector<8x32xf32> -> vector<16x32xf32>
    %68 = vector.extract_strided_slice %5 {offsets = [0, 128], sizes = [16, 128], strides = [1, 1]} : vector<16x256xf32> to vector<16x128xf32>
    %c1 = arith.constant 1 : index
    %c0_18 = arith.constant 0 : index
    %c0_19 = arith.constant 0 : index
    %69 = vector.load %arg5[%c1, %c0_18, %c0_19] : memref<2x32x128xf32, #tpu.memory_space<vmem>>, vector<1x32x128xf32>
    %70 = vector.shape_cast %69 : vector<1x32x128xf32> to vector<32x128xf32>
    %cst_20 = arith.constant 0.000000e+00 : f32
    %71 = vector.broadcast %cst_20 : f32 to vector<8x32xf32>
    %cst_21 = arith.constant 0.000000e+00 : f32
    %72 = vector.broadcast %cst_21 : f32 to vector<8x32xf32>
    %73 = vector.extract_strided_slice %68 {offsets = [8, 0], sizes = [8, 128], strides = [1, 1]} : vector<16x128xf32> to vector<8x128xf32>
    %cst_22 = arith.constant dense<0.000000e+00> : vector<8x128xf32>
    %74 = tpu.matmul %71, %70, %cst_22 {dimension_numbers = #tpu.dot_dimension_numbers<[1], [0], [0], [1], [0, 0, 1, 1], [], []>} : vector<8x32xf32>, vector<32x128xf32>, vector<8x128xf32> -> vector<8x128xf32>
    %75 = arith.addf %73, %74 : vector<8x128xf32>
    %76 = vector.extract_strided_slice %75 {offsets = [0, 0], sizes = [8, 32], strides = [1, 1]} : vector<8x128xf32> to vector<8x32xf32>
    %77 = arith.negf %76 : vector<8x32xf32>
    %78 = math.exp %77 : vector<8x32xf32>
    %cst_23 = arith.constant 1.000000e+00 : f32
    %79 = vector.broadcast %cst_23 : f32 to vector<8x32xf32>
    %80 = arith.addf %79, %78 : vector<8x32xf32>
    %81 = arith.divf %79, %80 : vector<8x32xf32>
    %82 = vector.extract_strided_slice %75 {offsets = [0, 32], sizes = [8, 32], strides = [1, 1]} : vector<8x128xf32> to vector<8x32xf32>
    %83 = arith.negf %82 : vector<8x32xf32>
    %84 = math.exp %83 : vector<8x32xf32>
    %cst_24 = arith.constant 1.000000e+00 : f32
    %85 = vector.broadcast %cst_24 : f32 to vector<8x32xf32>
    %86 = arith.addf %85, %84 : vector<8x32xf32>
    %87 = arith.divf %85, %86 : vector<8x32xf32>
    %88 = vector.extract_strided_slice %75 {offsets = [0, 64], sizes = [8, 32], strides = [1, 1]} : vector<8x128xf32> to vector<8x32xf32>
    %89 = math.tanh %88 : vector<8x32xf32>
    %90 = vector.extract_strided_slice %75 {offsets = [0, 96], sizes = [8, 32], strides = [1, 1]} : vector<8x128xf32> to vector<8x32xf32>
    %91 = arith.negf %90 : vector<8x32xf32>
    %92 = math.exp %91 : vector<8x32xf32>
    %cst_25 = arith.constant 1.000000e+00 : f32
    %93 = vector.broadcast %cst_25 : f32 to vector<8x32xf32>
    %94 = arith.addf %93, %92 : vector<8x32xf32>
    %95 = arith.divf %93, %94 : vector<8x32xf32>
    %96 = arith.mulf %87, %72 : vector<8x32xf32>
    %97 = arith.mulf %81, %89 : vector<8x32xf32>
    %98 = arith.addf %96, %97 : vector<8x32xf32>
    %99 = math.tanh %98 : vector<8x32xf32>
    %100 = arith.mulf %95, %99 : vector<8x32xf32>
    %101 = vector.extract_strided_slice %68 {offsets = [0, 0], sizes = [8, 128], strides = [1, 1]} : vector<16x128xf32> to vector<8x128xf32>
    %cst_26 = arith.constant dense<0.000000e+00> : vector<8x128xf32>
    %102 = tpu.matmul %100, %70, %cst_26 {dimension_numbers = #tpu.dot_dimension_numbers<[1], [0], [0], [1], [0, 0, 1, 1], [], []>} : vector<8x32xf32>, vector<32x128xf32>, vector<8x128xf32> -> vector<8x128xf32>
    %103 = arith.addf %101, %102 : vector<8x128xf32>
    %104 = vector.extract_strided_slice %103 {offsets = [0, 0], sizes = [8, 32], strides = [1, 1]} : vector<8x128xf32> to vector<8x32xf32>
    %105 = arith.negf %104 : vector<8x32xf32>
    %106 = math.exp %105 : vector<8x32xf32>
    %cst_27 = arith.constant 1.000000e+00 : f32
    %107 = vector.broadcast %cst_27 : f32 to vector<8x32xf32>
    %108 = arith.addf %107, %106 : vector<8x32xf32>
    %109 = arith.divf %107, %108 : vector<8x32xf32>
    %110 = vector.extract_strided_slice %103 {offsets = [0, 32], sizes = [8, 32], strides = [1, 1]} : vector<8x128xf32> to vector<8x32xf32>
    %111 = arith.negf %110 : vector<8x32xf32>
    %112 = math.exp %111 : vector<8x32xf32>
    %cst_28 = arith.constant 1.000000e+00 : f32
    %113 = vector.broadcast %cst_28 : f32 to vector<8x32xf32>
    %114 = arith.addf %113, %112 : vector<8x32xf32>
    %115 = arith.divf %113, %114 : vector<8x32xf32>
    %116 = vector.extract_strided_slice %103 {offsets = [0, 64], sizes = [8, 32], strides = [1, 1]} : vector<8x128xf32> to vector<8x32xf32>
    %117 = math.tanh %116 : vector<8x32xf32>
    %118 = vector.extract_strided_slice %103 {offsets = [0, 96], sizes = [8, 32], strides = [1, 1]} : vector<8x128xf32> to vector<8x32xf32>
    %119 = arith.negf %118 : vector<8x32xf32>
    %120 = math.exp %119 : vector<8x32xf32>
    %cst_29 = arith.constant 1.000000e+00 : f32
    %121 = vector.broadcast %cst_29 : f32 to vector<8x32xf32>
    %122 = arith.addf %121, %120 : vector<8x32xf32>
    %123 = arith.divf %121, %122 : vector<8x32xf32>
    %124 = arith.mulf %115, %98 : vector<8x32xf32>
    %125 = arith.mulf %109, %117 : vector<8x32xf32>
    %126 = arith.addf %124, %125 : vector<8x32xf32>
    %127 = math.tanh %126 : vector<8x32xf32>
    %128 = arith.mulf %123, %127 : vector<8x32xf32>
    %129 = tpu.concatenate %128, %100 in 0 : vector<8x32xf32>, vector<8x32xf32> -> vector<16x32xf32>
    %130 = tpu.concatenate %67, %129 in 1 : vector<16x32xf32>, vector<16x32xf32> -> vector<16x64xf32>
    %c0_30 = arith.constant 0 : index
    %c0_31 = arith.constant 0 : index
    %131 = vector.load %arg7[%c0_30, %c0_31] : memref<64x256xf32, #tpu.memory_space<vmem>>, vector<64x256xf32>
    %cst_32 = arith.constant dense<0.000000e+00> : vector<16x256xf32>
    %132 = tpu.matmul %130, %131, %cst_32 {dimension_numbers = #tpu.dot_dimension_numbers<[1], [0], [0], [1], [0, 0, 1, 1], [], []>} : vector<16x64xf32>, vector<64x256xf32>, vector<16x256xf32> -> vector<16x256xf32>
    %c0_33 = arith.constant 0 : index
    %c0_34 = arith.constant 0 : index
    %133 = vector.load %arg9[%c0_33, %c0_34] : memref<1x256xf32, #tpu.memory_space<vmem>>, vector<1x256xf32>
    %134 = vector.broadcast %133 : vector<1x256xf32> to vector<16x256xf32>
    %135 = arith.addf %132, %134 : vector<16x256xf32>
    %136 = vector.extract_strided_slice %135 {offsets = [0, 0], sizes = [16, 128], strides = [1, 1]} : vector<16x256xf32> to vector<16x128xf32>
    %c0_35 = arith.constant 0 : index
    %c0_36 = arith.constant 0 : index
    %c0_37 = arith.constant 0 : index
    %137 = vector.load %arg8[%c0_35, %c0_36, %c0_37] : memref<2x32x128xf32, #tpu.memory_space<vmem>>, vector<1x32x128xf32>
    %138 = vector.shape_cast %137 : vector<1x32x128xf32> to vector<32x128xf32>
    %cst_38 = arith.constant 0.000000e+00 : f32
    %139 = vector.broadcast %cst_38 : f32 to vector<8x32xf32>
    %cst_39 = arith.constant 0.000000e+00 : f32
    %140 = vector.broadcast %cst_39 : f32 to vector<8x32xf32>
    %141 = vector.extract_strided_slice %136 {offsets = [0, 0], sizes = [8, 128], strides = [1, 1]} : vector<16x128xf32> to vector<8x128xf32>
    %cst_40 = arith.constant dense<0.000000e+00> : vector<8x128xf32>
    %142 = tpu.matmul %139, %138, %cst_40 {dimension_numbers = #tpu.dot_dimension_numbers<[1], [0], [0], [1], [0, 0, 1, 1], [], []>} : vector<8x32xf32>, vector<32x128xf32>, vector<8x128xf32> -> vector<8x128xf32>
    %143 = arith.addf %141, %142 : vector<8x128xf32>
    %144 = vector.extract_strided_slice %143 {offsets = [0, 0], sizes = [8, 32], strides = [1, 1]} : vector<8x128xf32> to vector<8x32xf32>
    %145 = arith.negf %144 : vector<8x32xf32>
    %146 = math.exp %145 : vector<8x32xf32>
    %cst_41 = arith.constant 1.000000e+00 : f32
    %147 = vector.broadcast %cst_41 : f32 to vector<8x32xf32>
    %148 = arith.addf %147, %146 : vector<8x32xf32>
    %149 = arith.divf %147, %148 : vector<8x32xf32>
    %150 = vector.extract_strided_slice %143 {offsets = [0, 32], sizes = [8, 32], strides = [1, 1]} : vector<8x128xf32> to vector<8x32xf32>
    %151 = arith.negf %150 : vector<8x32xf32>
    %152 = math.exp %151 : vector<8x32xf32>
    %cst_42 = arith.constant 1.000000e+00 : f32
    %153 = vector.broadcast %cst_42 : f32 to vector<8x32xf32>
    %154 = arith.addf %153, %152 : vector<8x32xf32>
    %155 = arith.divf %153, %154 : vector<8x32xf32>
    %156 = vector.extract_strided_slice %143 {offsets = [0, 64], sizes = [8, 32], strides = [1, 1]} : vector<8x128xf32> to vector<8x32xf32>
    %157 = math.tanh %156 : vector<8x32xf32>
    %158 = vector.extract_strided_slice %143 {offsets = [0, 96], sizes = [8, 32], strides = [1, 1]} : vector<8x128xf32> to vector<8x32xf32>
    %159 = arith.negf %158 : vector<8x32xf32>
    %160 = math.exp %159 : vector<8x32xf32>
    %cst_43 = arith.constant 1.000000e+00 : f32
    %161 = vector.broadcast %cst_43 : f32 to vector<8x32xf32>
    %162 = arith.addf %161, %160 : vector<8x32xf32>
    %163 = arith.divf %161, %162 : vector<8x32xf32>
    %164 = arith.mulf %155, %140 : vector<8x32xf32>
    %165 = arith.mulf %149, %157 : vector<8x32xf32>
    %166 = arith.addf %164, %165 : vector<8x32xf32>
    %167 = math.tanh %166 : vector<8x32xf32>
    %168 = arith.mulf %163, %167 : vector<8x32xf32>
    %169 = vector.extract_strided_slice %136 {offsets = [8, 0], sizes = [8, 128], strides = [1, 1]} : vector<16x128xf32> to vector<8x128xf32>
    %cst_44 = arith.constant dense<0.000000e+00> : vector<8x128xf32>
    %170 = tpu.matmul %168, %138, %cst_44 {dimension_numbers = #tpu.dot_dimension_numbers<[1], [0], [0], [1], [0, 0, 1, 1], [], []>} : vector<8x32xf32>, vector<32x128xf32>, vector<8x128xf32> -> vector<8x128xf32>
    %171 = arith.addf %169, %170 : vector<8x128xf32>
    %172 = vector.extract_strided_slice %171 {offsets = [0, 0], sizes = [8, 32], strides = [1, 1]} : vector<8x128xf32> to vector<8x32xf32>
    %173 = arith.negf %172 : vector<8x32xf32>
    %174 = math.exp %173 : vector<8x32xf32>
    %cst_45 = arith.constant 1.000000e+00 : f32
    %175 = vector.broadcast %cst_45 : f32 to vector<8x32xf32>
    %176 = arith.addf %175, %174 : vector<8x32xf32>
    %177 = arith.divf %175, %176 : vector<8x32xf32>
    %178 = vector.extract_strided_slice %171 {offsets = [0, 32], sizes = [8, 32], strides = [1, 1]} : vector<8x128xf32> to vector<8x32xf32>
    %179 = arith.negf %178 : vector<8x32xf32>
    %180 = math.exp %179 : vector<8x32xf32>
    %cst_46 = arith.constant 1.000000e+00 : f32
    %181 = vector.broadcast %cst_46 : f32 to vector<8x32xf32>
    %182 = arith.addf %181, %180 : vector<8x32xf32>
    %183 = arith.divf %181, %182 : vector<8x32xf32>
    %184 = vector.extract_strided_slice %171 {offsets = [0, 64], sizes = [8, 32], strides = [1, 1]} : vector<8x128xf32> to vector<8x32xf32>
    %185 = math.tanh %184 : vector<8x32xf32>
    %186 = vector.extract_strided_slice %171 {offsets = [0, 96], sizes = [8, 32], strides = [1, 1]} : vector<8x128xf32> to vector<8x32xf32>
    %187 = arith.negf %186 : vector<8x32xf32>
    %188 = math.exp %187 : vector<8x32xf32>
    %cst_47 = arith.constant 1.000000e+00 : f32
    %189 = vector.broadcast %cst_47 : f32 to vector<8x32xf32>
    %190 = arith.addf %189, %188 : vector<8x32xf32>
    %191 = arith.divf %189, %190 : vector<8x32xf32>
    %192 = arith.mulf %183, %166 : vector<8x32xf32>
    %193 = arith.mulf %177, %185 : vector<8x32xf32>
    %194 = arith.addf %192, %193 : vector<8x32xf32>
    %195 = math.tanh %194 : vector<8x32xf32>
    %196 = arith.mulf %191, %195 : vector<8x32xf32>
    %197 = tpu.concatenate %168, %196 in 0 : vector<8x32xf32>, vector<8x32xf32> -> vector<16x32xf32>
    %198 = vector.extract_strided_slice %135 {offsets = [0, 128], sizes = [16, 128], strides = [1, 1]} : vector<16x256xf32> to vector<16x128xf32>
    %c1_48 = arith.constant 1 : index
    %c0_49 = arith.constant 0 : index
    %c0_50 = arith.constant 0 : index
    %199 = vector.load %arg8[%c1_48, %c0_49, %c0_50] : memref<2x32x128xf32, #tpu.memory_space<vmem>>, vector<1x32x128xf32>
    %200 = vector.shape_cast %199 : vector<1x32x128xf32> to vector<32x128xf32>
    %cst_51 = arith.constant 0.000000e+00 : f32
    %201 = vector.broadcast %cst_51 : f32 to vector<8x32xf32>
    %cst_52 = arith.constant 0.000000e+00 : f32
    %202 = vector.broadcast %cst_52 : f32 to vector<8x32xf32>
    %203 = vector.extract_strided_slice %198 {offsets = [8, 0], sizes = [8, 128], strides = [1, 1]} : vector<16x128xf32> to vector<8x128xf32>
    %cst_53 = arith.constant dense<0.000000e+00> : vector<8x128xf32>
    %204 = tpu.matmul %201, %200, %cst_53 {dimension_numbers = #tpu.dot_dimension_numbers<[1], [0], [0], [1], [0, 0, 1, 1], [], []>} : vector<8x32xf32>, vector<32x128xf32>, vector<8x128xf32> -> vector<8x128xf32>
    %205 = arith.addf %203, %204 : vector<8x128xf32>
    %206 = vector.extract_strided_slice %205 {offsets = [0, 0], sizes = [8, 32], strides = [1, 1]} : vector<8x128xf32> to vector<8x32xf32>
    %207 = arith.negf %206 : vector<8x32xf32>
    %208 = math.exp %207 : vector<8x32xf32>
    %cst_54 = arith.constant 1.000000e+00 : f32
    %209 = vector.broadcast %cst_54 : f32 to vector<8x32xf32>
    %210 = arith.addf %209, %208 : vector<8x32xf32>
    %211 = arith.divf %209, %210 : vector<8x32xf32>
    %212 = vector.extract_strided_slice %205 {offsets = [0, 32], sizes = [8, 32], strides = [1, 1]} : vector<8x128xf32> to vector<8x32xf32>
    %213 = arith.negf %212 : vector<8x32xf32>
    %214 = math.exp %213 : vector<8x32xf32>
    %cst_55 = arith.constant 1.000000e+00 : f32
    %215 = vector.broadcast %cst_55 : f32 to vector<8x32xf32>
    %216 = arith.addf %215, %214 : vector<8x32xf32>
    %217 = arith.divf %215, %216 : vector<8x32xf32>
    %218 = vector.extract_strided_slice %205 {offsets = [0, 64], sizes = [8, 32], strides = [1, 1]} : vector<8x128xf32> to vector<8x32xf32>
    %219 = math.tanh %218 : vector<8x32xf32>
    %220 = vector.extract_strided_slice %205 {offsets = [0, 96], sizes = [8, 32], strides = [1, 1]} : vector<8x128xf32> to vector<8x32xf32>
    %221 = arith.negf %220 : vector<8x32xf32>
    %222 = math.exp %221 : vector<8x32xf32>
    %cst_56 = arith.constant 1.000000e+00 : f32
    %223 = vector.broadcast %cst_56 : f32 to vector<8x32xf32>
    %224 = arith.addf %223, %222 : vector<8x32xf32>
    %225 = arith.divf %223, %224 : vector<8x32xf32>
    %226 = arith.mulf %217, %202 : vector<8x32xf32>
    %227 = arith.mulf %211, %219 : vector<8x32xf32>
    %228 = arith.addf %226, %227 : vector<8x32xf32>
    %229 = math.tanh %228 : vector<8x32xf32>
    %230 = arith.mulf %225, %229 : vector<8x32xf32>
    %231 = vector.extract_strided_slice %198 {offsets = [0, 0], sizes = [8, 128], strides = [1, 1]} : vector<16x128xf32> to vector<8x128xf32>
    %cst_57 = arith.constant dense<0.000000e+00> : vector<8x128xf32>
    %232 = tpu.matmul %230, %200, %cst_57 {dimension_numbers = #tpu.dot_dimension_numbers<[1], [0], [0], [1], [0, 0, 1, 1], [], []>} : vector<8x32xf32>, vector<32x128xf32>, vector<8x128xf32> -> vector<8x128xf32>
    %233 = arith.addf %231, %232 : vector<8x128xf32>
    %234 = vector.extract_strided_slice %233 {offsets = [0, 0], sizes = [8, 32], strides = [1, 1]} : vector<8x128xf32> to vector<8x32xf32>
    %235 = arith.negf %234 : vector<8x32xf32>
    %236 = math.exp %235 : vector<8x32xf32>
    %cst_58 = arith.constant 1.000000e+00 : f32
    %237 = vector.broadcast %cst_58 : f32 to vector<8x32xf32>
    %238 = arith.addf %237, %236 : vector<8x32xf32>
    %239 = arith.divf %237, %238 : vector<8x32xf32>
    %240 = vector.extract_strided_slice %233 {offsets = [0, 32], sizes = [8, 32], strides = [1, 1]} : vector<8x128xf32> to vector<8x32xf32>
    %241 = arith.negf %240 : vector<8x32xf32>
    %242 = math.exp %241 : vector<8x32xf32>
    %cst_59 = arith.constant 1.000000e+00 : f32
    %243 = vector.broadcast %cst_59 : f32 to vector<8x32xf32>
    %244 = arith.addf %243, %242 : vector<8x32xf32>
    %245 = arith.divf %243, %244 : vector<8x32xf32>
    %246 = vector.extract_strided_slice %233 {offsets = [0, 64], sizes = [8, 32], strides = [1, 1]} : vector<8x128xf32> to vector<8x32xf32>
    %247 = math.tanh %246 : vector<8x32xf32>
    %248 = vector.extract_strided_slice %233 {offsets = [0, 96], sizes = [8, 32], strides = [1, 1]} : vector<8x128xf32> to vector<8x32xf32>
    %249 = arith.negf %248 : vector<8x32xf32>
    %250 = math.exp %249 : vector<8x32xf32>
    %cst_60 = arith.constant 1.000000e+00 : f32
    %251 = vector.broadcast %cst_60 : f32 to vector<8x32xf32>
    %252 = arith.addf %251, %250 : vector<8x32xf32>
    %253 = arith.divf %251, %252 : vector<8x32xf32>
    %254 = arith.mulf %245, %228 : vector<8x32xf32>
    %255 = arith.mulf %239, %247 : vector<8x32xf32>
    %256 = arith.addf %254, %255 : vector<8x32xf32>
    %257 = math.tanh %256 : vector<8x32xf32>
    %258 = arith.mulf %253, %257 : vector<8x32xf32>
    %259 = tpu.concatenate %258, %230 in 0 : vector<8x32xf32>, vector<8x32xf32> -> vector<16x32xf32>
    %260 = tpu.concatenate %197, %259 in 1 : vector<16x32xf32>, vector<16x32xf32> -> vector<16x64xf32>
    %c0_61 = arith.constant 0 : index
    %c0_62 = arith.constant 0 : index
    %261 = vector.load %arg10[%c0_61, %c0_62] : memref<64x16xf32, #tpu.memory_space<vmem>>, vector<64x16xf32>
    %cst_63 = arith.constant dense<0.000000e+00> : vector<16x16xf32>
    %262 = tpu.matmul %260, %261, %cst_63 {dimension_numbers = #tpu.dot_dimension_numbers<[1], [0], [0], [1], [0, 0, 1, 1], [], []>} : vector<16x64xf32>, vector<64x16xf32>, vector<16x16xf32> -> vector<16x16xf32>
    %c0_64 = arith.constant 0 : index
    %c0_65 = arith.constant 0 : index
    %263 = vector.load %arg11[%c0_64, %c0_65] : memref<1x16xf32, #tpu.memory_space<vmem>>, vector<1x16xf32>
    %264 = vector.broadcast %263 : vector<1x16xf32> to vector<16x16xf32>
    %265 = arith.addf %262, %264 : vector<16x16xf32>
    %266 = vector.extract_strided_slice %265 {offsets = [0, 0], sizes = [16, 8], strides = [1, 1]} : vector<16x16xf32> to vector<16x8xf32>
    %267 = vector.extract_strided_slice %265 {offsets = [0, 8], sizes = [16, 8], strides = [1, 1]} : vector<16x16xf32> to vector<16x8xf32>
    %cst_66 = arith.constant dense<0xFF800000> : vector<16xf32>
    %268 = vector.multi_reduction <maximumf>, %266, %cst_66 [1] : vector<16x8xf32> to vector<16xf32>
    %269 = vector.shape_cast %268 : vector<16xf32> to vector<16x1xf32>
    %270 = vector.broadcast %269 : vector<16x1xf32> to vector<16x8xf32>
    %271 = arith.subf %266, %270 : vector<16x8xf32>
    %272 = math.exp %271 : vector<16x8xf32>
    %cst_67 = arith.constant dense<0.000000e+00> : vector<16xf32>
    %273 = vector.multi_reduction <add>, %272, %cst_67 [1] : vector<16x8xf32> to vector<16xf32>
    %274 = vector.shape_cast %273 : vector<16xf32> to vector<16x1xf32>
    %275 = tpu.reciprocal %274 {approx = true} : vector<16x1xf32> -> vector<16x1xf32>
    %276 = vector.broadcast %275 : vector<16x1xf32> to vector<16x8xf32>
    %277 = arith.mulf %272, %276 : vector<16x8xf32>
    %cst_68 = arith.constant 1.000000e+00 : f32
    %278 = vector.broadcast %cst_68 : f32 to vector<16x8xf32>
    %279 = arith.addf %278, %267 : vector<16x8xf32>
    %280 = arith.mulf %266, %266 : vector<16x8xf32>
    %281 = arith.subf %279, %280 : vector<16x8xf32>
    %282 = math.exp %267 : vector<16x8xf32>
    %283 = arith.subf %281, %282 : vector<16x8xf32>
    %cst_69 = arith.constant dense<0.000000e+00> : vector<16xf32>
    %284 = vector.multi_reduction <add>, %283, %cst_69 [1] : vector<16x8xf32> to vector<16xf32>
    %285 = vector.shape_cast %284 : vector<16xf32> to vector<16x1xf32>
    %cst_70 = arith.constant -5.000000e-01 : f32
    %286 = vector.broadcast %cst_70 : f32 to vector<16x1xf32>
    %287 = arith.mulf %286, %285 : vector<16x1xf32>
    %cst_71 = arith.constant dense<0.000000e+00> : vector<1xf32>
    %288 = vector.multi_reduction <add>, %287, %cst_71 [0] : vector<16x1xf32> to vector<1xf32>
    %289 = vector.shape_cast %288 : vector<1xf32> to vector<1x1xf32>
    %cst_72 = arith.constant 6.250000e-02 : f32
    %290 = vector.broadcast %cst_72 : f32 to vector<1x1xf32>
    %291 = arith.mulf %289, %290 : vector<1x1xf32>
    %292 = vector.extract_strided_slice %277 {offsets = [0, 0], sizes = [8, 8], strides = [1, 1]} : vector<16x8xf32> to vector<8x8xf32>
    %cst_73 = arith.constant dense<0xFF800000> : vector<8xf32>
    %293 = vector.multi_reduction <maximumf>, %292, %cst_73 [0] : vector<8x8xf32> to vector<8xf32>
    %294 = vector.shape_cast %293 : vector<8xf32> to vector<1x8xf32>
    %295 = vector.extract_strided_slice %277 {offsets = [8, 0], sizes = [8, 8], strides = [1, 1]} : vector<16x8xf32> to vector<8x8xf32>
    %cst_74 = arith.constant dense<0xFF800000> : vector<8xf32>
    %296 = vector.multi_reduction <maximumf>, %295, %cst_74 [0] : vector<8x8xf32> to vector<8xf32>
    %297 = vector.shape_cast %296 : vector<8xf32> to vector<1x8xf32>
    %298 = tpu.concatenate %294, %297 in 0 : vector<1x8xf32>, vector<1x8xf32> -> vector<2x8xf32>
    %c0_75 = arith.constant 0 : index
    %c0_76 = arith.constant 0 : index
    %299 = vector.load %arg12[%c0_75, %c0_76] : memref<8x32xf32, #tpu.memory_space<vmem>>, vector<8x32xf32>
    %c0_77 = arith.constant 0 : index
    %c0_78 = arith.constant 0 : index
    %300 = vector.load %arg3[%c0_77, %c0_78] : memref<32x128xf32, #tpu.memory_space<vmem>>, vector<32x128xf32>
    %cst_79 = arith.constant dense<0.000000e+00> : vector<8x128xf32>
    %301 = tpu.matmul %299, %300, %cst_79 {dimension_numbers = #tpu.dot_dimension_numbers<[1], [0], [0], [1], [0, 0, 1, 1], [], []>} : vector<8x32xf32>, vector<32x128xf32>, vector<8x128xf32> -> vector<8x128xf32>
    %cst_80 = arith.constant dense<0xFF800000> : vector<8xf32>
    %302 = vector.multi_reduction <maximumf>, %301, %cst_80 [1] : vector<8x128xf32> to vector<8xf32>
    %303 = vector.shape_cast %302 : vector<8xf32> to vector<8x1xf32>
    %304 = vector.broadcast %303 : vector<8x1xf32> to vector<8x128xf32>
    %305 = arith.subf %301, %304 : vector<8x128xf32>
    %306 = math.exp %305 : vector<8x128xf32>
    %cst_81 = arith.constant dense<0.000000e+00> : vector<8xf32>
    %307 = vector.multi_reduction <add>, %306, %cst_81 [1] : vector<8x128xf32> to vector<8xf32>
    %308 = vector.shape_cast %307 : vector<8xf32> to vector<8x1xf32>
    %309 = tpu.reciprocal %308 {approx = true} : vector<8x1xf32> -> vector<8x1xf32>
    %310 = vector.broadcast %309 : vector<8x1xf32> to vector<8x128xf32>
    %311 = arith.mulf %306, %310 : vector<8x128xf32>
    %cst_82 = arith.constant dense<0.000000e+00> : vector<2x128xf32>
    %312 = tpu.matmul %298, %311, %cst_82 {dimension_numbers = #tpu.dot_dimension_numbers<[1], [0], [0], [1], [0, 0, 1, 1], [], []>} : vector<2x8xf32>, vector<8x128xf32>, vector<2x128xf32> -> vector<2x128xf32>
    %cst_83 = arith.constant 9.99999997E-7 : f32
    %313 = vector.broadcast %cst_83 : f32 to vector<2x128xf32>
    %314 = arith.addf %312, %313 : vector<2x128xf32>
    %315 = math.log %314 : vector<2x128xf32>
    %c0_84 = arith.constant 0 : index
    %c0_85 = arith.constant 0 : index
    %316 = vector.load %arg2[%c0_84, %c0_85] : memref<2x128xf32, #tpu.memory_space<vmem>>, vector<2x128xf32>
    %317 = arith.mulf %315, %316 : vector<2x128xf32>
    %cst_86 = arith.constant dense<0.000000e+00> : vector<2xf32>
    %318 = vector.multi_reduction <add>, %317, %cst_86 [1] : vector<2x128xf32> to vector<2xf32>
    %319 = vector.shape_cast %318 : vector<2xf32> to vector<2x1xf32>
    %cst_87 = arith.constant 0.000000e+00 : f32
    %320 = vector.broadcast %cst_87 : f32 to vector<2x1xf32>
    %321 = arith.subf %320, %319 : vector<2x1xf32>
    %322 = vector.shape_cast %321 : vector<2x1xf32> to vector<2x1xf32>
    %323 = vector.broadcast %322 : vector<2x1xf32> to vector<2x128xf32>
    %324 = vector.shape_cast %291 : vector<1x1xf32> to vector<1x1xf32>
    %325 = vector.broadcast %324 : vector<1x1xf32> to vector<1x128xf32>
    %cst_88 = arith.constant 0.000000e+00 : f32
    %326 = vector.broadcast %cst_88 : f32 to vector<5x128xf32>
    %327 = tpu.concatenate %323, %325, %326 in 0 : vector<2x128xf32>, vector<1x128xf32>, vector<5x128xf32> -> vector<8x128xf32>
    %c0_89 = arith.constant 0 : index
    %c0_90 = arith.constant 0 : index
    %328 = vector.load %arg13[%c0_89, %c0_90] : memref<8x128xf32, #tpu.memory_space<vmem>>, vector<8x128xf32>
    tpu.vector_store %arg13[%c0_89, %c0_90], %327 {strides = array<i32>} : memref<8x128xf32, #tpu.memory_space<vmem>>, vector<8x128xf32>,
    return
  }
  func.func @transform_0(%arg0: i32) -> (i32, i32) {
    %c0_i32 = arith.constant 0 : i32
    %c0_i32_0 = arith.constant 0 : i32
    %c0_i32_1 = arith.constant 0 : i32
    return %c0_i32, %c0_i32_0 : i32, i32
  }
  func.func @transform_1(%arg0: i32) -> (i32, i32) {
    %c0_i32 = arith.constant 0 : i32
    %c0_i32_0 = arith.constant 0 : i32
    %c0_i32_1 = arith.constant 0 : i32
    return %c0_i32, %c0_i32_0 : i32, i32
  }
  func.func @transform_2(%arg0: i32) -> (i32, i32) {
    %c0_i32 = arith.constant 0 : i32
    %c0_i32_0 = arith.constant 0 : i32
    %c0_i32_1 = arith.constant 0 : i32
    return %c0_i32, %c0_i32_0 : i32, i32
  }
  func.func @transform_3(%arg0: i32) -> (i32, i32) {
    %c0_i32 = arith.constant 0 : i32
    %c0_i32_0 = arith.constant 0 : i32
    %c0_i32_1 = arith.constant 0 : i32
    return %c0_i32, %c0_i32_0 : i32, i32
  }
  func.func @transform_4(%arg0: i32) -> (i32, i32, i32) {
    %c0_i32 = arith.constant 0 : i32
    %c0_i32_0 = arith.constant 0 : i32
    %c0_i32_1 = arith.constant 0 : i32
    %c0_i32_2 = arith.constant 0 : i32
    return %c0_i32, %c0_i32_0, %c0_i32_1 : i32, i32, i32
  }
  func.func @transform_5(%arg0: i32) -> (i32, i32) {
    %c0_i32 = arith.constant 0 : i32
    %c0_i32_0 = arith.constant 0 : i32
    %c0_i32_1 = arith.constant 0 : i32
    return %c0_i32, %c0_i32_0 : i32, i32
  }
  func.func @transform_6(%arg0: i32) -> (i32, i32) {
    %c0_i32 = arith.constant 0 : i32
    %c0_i32_0 = arith.constant 0 : i32
    %c0_i32_1 = arith.constant 0 : i32
    return %c0_i32, %c0_i32_0 : i32, i32
  }
  func.func @transform_7(%arg0: i32) -> (i32, i32, i32) {
    %c0_i32 = arith.constant 0 : i32
    %c0_i32_0 = arith.constant 0 : i32
    %c0_i32_1 = arith.constant 0 : i32
    %c0_i32_2 = arith.constant 0 : i32
    return %c0_i32, %c0_i32_0, %c0_i32_1 : i32, i32, i32
  }
  func.func @transform_8(%arg0: i32) -> (i32, i32) {
    %c0_i32 = arith.constant 0 : i32
    %c0_i32_0 = arith.constant 0 : i32
    %c0_i32_1 = arith.constant 0 : i32
    return %c0_i32, %c0_i32_0 : i32, i32
  }
  func.func @transform_9(%arg0: i32) -> (i32, i32) {
    %c0_i32 = arith.constant 0 : i32
    %c0_i32_0 = arith.constant 0 : i32
    %c0_i32_1 = arith.constant 0 : i32
    return %c0_i32, %c0_i32_0 : i32, i32
  }
  func.func @transform_10(%arg0: i32) -> (i32, i32) {
    %c0_i32 = arith.constant 0 : i32
    %c0_i32_0 = arith.constant 0 : i32
    %c0_i32_1 = arith.constant 0 : i32
    return %c0_i32, %c0_i32_0 : i32, i32
  }
  func.func @transform_11(%arg0: i32) -> (i32, i32) {
    %c0_i32 = arith.constant 0 : i32
    %c0_i32_0 = arith.constant 0 : i32
    %c0_i32_1 = arith.constant 0 : i32
    return %c0_i32, %c0_i32_0 : i32, i32
  }
  func.func @transform_12(%arg0: i32) -> (i32, i32) {
    %c0_i32 = arith.constant 0 : i32
    %c0_i32_0 = arith.constant 0 : i32
    %c0_i32_1 = arith.constant 0 : i32
    return %c0_i32, %c0_i32_0 : i32, i32
  }
}

</mosaic_0001>

<bundles_post_ra>
// kernel: model_forward.1
= control target key start
LH: loop header
LB: loop body
LE: loop exit
PB: predicated region body
PF: predicated region fallthrough
CT: control target
= control target key end

     0   :  { %v1836_v0 = vmov 0.0|0.0   ;;  %v1837_v4 = vmov 0.0   ;;  %vm1838_vm0 = vmmov 0   ;;  %vm63_vm1 = vcmask 261120   ;;  %s1840_s20 = smov 32   ;;  %s2255_s3 = inlined_call_operand.vmem [shape: f32[32,256], index: 3, kind: input, shape index: {}]   ;;  %s2256_s4 = inlined_call_operand.vmem [shape: f32[2,32,128], index: 4, kind: input, shape index: {}]   ;;  %s2257_s0 = inlined_call_operand.vmem [shape: f32[16,32], index: 0, kind: input, shape index: {}]   ;;  %s2258_s5 = inlined_call_operand.vmem [shape: f32[1,256], index: 5, kind: input, shape index: {}]   ;;  %s2259_s6 = inlined_call_operand.vmem [shape: f32[64,256], index: 6, kind: input, shape index: {}]   ;;  %s2260_s7 = inlined_call_operand.vmem [shape: f32[2,32,128], index: 7, kind: input, shape index: {}]   ;;  %s2261_s8 = inlined_call_operand.vmem [shape: f32[1,256], index: 8, kind: input, shape index: {}]   ;;  %s2262_s9 = inlined_call_operand.vmem [shape: f32[64,16], index: 9, kind: input, shape index: {}]   ;;  %s2263_s2 = inlined_call_operand.vmem [shape: f32[32,128], index: 2, kind: input, shape index: {}]   ;;  %s2264_s11 = inlined_call_operand.vmem [shape: f32[8,32], index: 11, kind: input, shape index: {}]   ;;  %s2265_s10 = inlined_call_operand.vmem [shape: f32[1,16], index: 10, kind: input, shape index: {}]   ;;  %s2266_s1 = inlined_call_operand.vmem [shape: f32[2,128], index: 1, kind: input, shape index: {}]   ;;  %s2267_s12 = inlined_call_operand.vmem [shape: f32[8,128], index: 12, kind: output, shape index: {}]  }
   0x1   :  { %1661 = vmatprep.subr.bf16.mxu1 %v1836_v0  ;;  %v44_v1 = vld [vmem:[%s2255_s3 + $0x8] sm:$0xff]  ;;  %v46_v2 = vld [vmem:[%s2255_s3 + $0x18] sm:$0xff]  ;;  %v147_v3 = vld [vmem:[%s2256_s4] sm:$0xff]  ;;  %134 = vmatprep.mubr.f32.mxu0 %v1837_v4  ;;  %v53_v28 = vlaneseq  ;;  %vm591_vm2 = vcmask 523264   ;;  %vm1184_vm3 = vcmask 64512   ;;  %vm1265_vm4 = vcmask 1040384  }
   0x2   :  { %v1653_v5 = vpack.c.bf16 %v46_v2, %v44_v1  ;;  %v148_v6 = vld [vmem:[%s2256_s4 + $0x8] sm:$0xff]  ;;  %v43_v7 = vld [vmem:[%s2255_s3] sm:$0xff]  ;;  %v45_v8 = vld [vmem:[%s2255_s3 + $0x10] sm:$0xff]  ;;  %1538 = vmatprep.mubr.msk.f32.mxu1 %vm1838_vm0, %v1837_v4  ;;  %vm1431_vm5 = vcmask 1041408   ;;  %vm1437_vm6 = vcmask 1042432  }
   0x3   :  { %v1662_v9 = vpack.c.bf16 %v148_v6, %v147_v3  ;;  %v1655_v10 = vpack.c.bf16 %v45_v8, %v43_v7  ;;  %v48_v11 = vld [vmem:[%s2255_s3 + $0x28] sm:$0xff]  ;;  %v50_v12 = vld [vmem:[%s2255_s3 + $0x38] sm:$0xff]  ;;  %v149_v13 = vld [vmem:[%s2256_s4 + $0x10] sm:$0xff]  ;;  %v1988_v29 = vshrl.u32 %v53_v28, 7 }
   0x4   :  { %1654 = vmatprep.subr.bf16.mxu0 %v1653_v5  ;;  %v1657_v14 = vpack.c.bf16 %v50_v12, %v48_v11  ;;  %v150_v15 = vld [vmem:[%s2256_s4 + $0x18] sm:$0xff]  ;;  %v47_v16 = vld [vmem:[%s2255_s3 + $0x20] sm:$0xff]  ;;  %v49_v17 = vld [vmem:[%s2255_s3 + $0x30] sm:$0xff] }
   0x5   :  { %1663 = vmatpush3.bf16.msra.mxu1 %v1662_v9  ;;  %1656 = vmatpush1.bf16.msra.mxu0 %v1655_v10  ;;  %v1665_v18 = vpack.c.bf16 %v150_v15, %v149_v13  ;;  %v1659_v19 = vpack.c.bf16 %v49_v17, %v47_v16  ;;  %v1449_v20 = vld [vmem:[%s2256_s4 + $0x20] sm:$0xff]  ;;  %v1450_v21 = vld [vmem:[%s2256_s4 + $0x28] sm:$0xff]  ;;  %v1451_v24 = vld [vmem:[%s2256_s4 + $0x30] sm:$0xff]  ;;  %v55_v30 = vsub.s32 0, %v1988_v29  ;;  %v59_v32 = vsub.s32 1, %v1988_v29 }
   0x6   :  { %1664 = vmatprep.subr.bf16.mxu1 %v1836_v0  ;;  %1658 = vmatprep.subr.bf16.mxu0 %v1657_v14  ;;  %v41_v22 = vld [vmem:[%s2257_s0] sm:$0xff]  ;;  %v1958_v23 = vpack.c.bf16 %v1450_v21, %v1449_v20  ;;  %v1452_v25 = vld [vmem:[%s2256_s4 + $0x38] sm:$0xff]  ;;  %v42_v26 = vld [vmem:[%s2257_s0 + $0x8] sm:$0xff] }
   0x7   :  { %v1975_v27 = vpack.c.bf16 %v1452_v25, %v1451_v24  ;;  %v51_v31 = vld [vmem:[%s2258_s5] sm:$0x3]  ;;  %s1839_s5 = smov 64  }
   0x8   :  { %v56_v33 = vrot.slane %v51_v31, %v55_v30  ;;  %v60_v34 = vrot.slane %v51_v31, %v59_v32 }
   0x9   :  { %1666 = vmatpush3.bf16.msra.mxu1 %v1665_v18  ;;  %1660 = vmatpush1.bf16.msra.mxu0 %v1659_v19 }
   0xa   :  { %1673 = vmatprep.subr.bf16.mxu1 %v1836_v0  ;;  %1667 = vmatprep.subr.bf16.mxu0 %v1836_v0 }
   0xc   :  { %1444 = vmatmul.mubr.msk.f32.vlgmr.msra.gmra.mrb[0].mxu0 %vm63_vm1, %v41_v22  ;;  %1539 = vmatmul.mubr.f32.vlgmr.msra.gmra.mrb[0].mxu1 %v1837_v4 }
   0xd   :  { %1675 = vmatpush3.bf16.msra.mxu1 %v1958_v23  ;;  %140 = vmatprep.mubr.f32.mxu0 %v1837_v4 }
   0xe   :  { %1676 = vmatprep.subr.bf16.mxu1 %v1836_v0  ;;  %1560 = vmatprep.mubr.msk.f32.mxu1 %vm1838_vm0, %v1837_v4 }
   0xf   :  { %1669 = vmatpush3.bf16.msra.mxu0 %v1662_v9 }
  0x10   :  { %1445 = vmatmul.mubr.msk.f32.gmra.mrb[2].mxu0 %vm63_vm1, %v42_v26  ;;  %1670 = vmatprep.subr.bf16.mxu0 %v1836_v0 }
  0x11   :  { %1678 = vmatpush3.bf16.msra.mxu1 %v1975_v27  ;;  %1549 = vmatprep.mubr.msk.f32.mxu0 %vm1838_vm0, %v1837_v4 }
  0x13   :  { %1672 = vmatpush3.bf16.msra.mxu0 %v1665_v18 }
  0x14   :  { %1561 = vmatmul.mubr.f32.vlgmr.msra.gmra.mrb[2].mxu1 %v1837_v4  ;;  %1679 = vmatprep.subr.bf16.mxu0 %v1836_v0 }
  0x15   :  { %662 = vmatprep.mubr.f32.mxu1 %v1837_v4 }
  0xdf   :  { %v136_v35 = vpop.f32.mrb[0].mxu0  ;;  %v220_v36 = vpop.f32.mrb[0].mxu1 }
  0xe0   :  { %v137_v37 = vadd.f32 %v136_v35, %v56_v33  ;;  %v138_v38 = vpop.f32.mrb[1].mxu0  ;;  %v1540_v39 = vpop.f32.mrb[1].mxu1 }
  0xe1   :  { %v1999_v40 = vadd.f32 %v138_v38, %v60_v34 }
  0xe2   :  { %v224_v41 = vadd.f32 %v220_v36, %v137_v37 }
  0xe3   :  { %v142_v42 = vpop.f32.mrb[2].mxu0 }
  0xe4   :  { %1754 = vtanh.f32 %v224_v41  ;;  %v143_v43 = vadd.f32 %v142_v42, %v56_v33  ;;  %v144_v44 = vpop.f32.mrb[3].mxu0  ;;  %v1446_v51 = vmul.f32 -1.442695, %v224_v41 }
  0xe5   :  { %v145_v45 = vadd.f32 %v144_v44, %v60_v34 }
  0xe7   :  { %v420_v46 = vpop.f32.mrb[2].mxu1 }
  0xe8   :  { %v424_v47 = vadd.f32 %v420_v46, %v145_v45  ;;  %v1562_v48 = vpop.f32.mrb[3].mxu1  ;;  %v564_v45 = vld [vmem:[%s2259_s6 + $0x8] sm:$0xff]  ;;  %v566_v46 = vld [vmem:[%s2259_s6 + $0x18] sm:$0xff] }
  0xe9   :  { %v1685_v48 = vpack.c.bf16 %v566_v46, %v564_v45 }
  0xea   :  { %1756 = vtanh.f32 %v424_v47  ;;  %v1453_v52 = vmul.f32 -1.442695, %v424_v47  ;;  %v563_v47 = vld [vmem:[%s2259_s6] sm:$0xff] }
  0xeb   :  { %1758 = vpow2.f32 %v1446_v51  ;;  %v570_v51 = vld [vmem:[%s2259_s6 + $0x38] sm:$0xff]  ;;  %1686 = vmatprep.subr.bf16.mxu1 %v1685_v48 }
  0xec   :  { %1760 = vpow2.f32 %v1453_v52 }
  0xee   :  { %v1755_v49 = vpop.eup %1754 }
  0xef   :  { %234 = vrot.lane.b32.xlu0 %v1755_v49, %s1839_s5  ;;  %v565_v49 = vld [vmem:[%s2259_s6 + $0x10] sm:$0xff] }
  0xf0   :  { %v1687_v52 = vpack.c.bf16 %v565_v49, %v563_v47 }
  0xf2   :  { %1688 = vmatpush1.bf16.msra.mxu1 %v1687_v52 }
  0xf4   :  { %v1757_v50 = vpop.eup %1756 }
  0xf5   :  { %434 = vrot.lane.b32.xlu0 %v1757_v50, %s1839_s5  ;;  %v1759_v53 = vpop.eup %1758  ;;  %v568_v50 = vld [vmem:[%s2259_s6 + $0x28] sm:$0xff] }
  0xf6   :  { %v228_v54 = vadd.f32 1.0, %v1759_v53  ;;  %v1761_v55 = vpop.eup %1760  ;;  %v1689_v53 = vpack.c.bf16 %v570_v51, %v568_v50 }
  0xf7   :  { %v428_v56 = vadd.f32 1.0, %v1761_v55  ;;  %v569_v55 = vld [vmem:[%s2259_s6 + $0x30] sm:$0xff] }
  0xf8   :  { %1762 = vrcp.f32 %v228_v54  ;;  %v567_v54 = vld [vmem:[%s2259_s6 + $0x20] sm:$0xff]  ;;  %1690 = vmatprep.subr.bf16.mxu1 %v1689_v53 }
  0xf9   :  { %1764 = vrcp.f32 %v428_v56  ;;  %v1691_v56 = vpack.c.bf16 %v569_v55, %v567_v54 }
  0xfb   :  { %1692 = vmatpush1.bf16.msra.mxu1 %v1691_v56 }
 0x102   :  { %v1763_v57 = vpop.eup %1762 }
 0x103   :  { %v1765_v60 = vpop.eup %1764  ;;  %v232_v63 = vmul.f32 0.0, %v1763_v57 }
 0x104   :  { %v432_v3 = vmul.f32 0.0, %v1765_v60 }
 0x161   :  { %v235_v58 = vpop.permute.xlu0 %234 }
 0x162   :  { %v237_v59 = vmul.f32 %v1763_v57, %v235_v58  ;;  %v572_v58 = vld [vmem:[%s2259_s6 + $0x48] sm:$0xff] }
 0x164   :  { %239 = vrot.lane.b32.xlu1 %v237_v59, %s1840_s20  ;;  %v574_v59 = vld [vmem:[%s2259_s6 + $0x58] sm:$0xff] }
 0x167   :  { %v435_v61 = vpop.permute.xlu0 %434 }
 0x168   :  { %v437_v62 = vmul.f32 %v1765_v60, %v435_v61  ;;  %v571_v61 = vld [vmem:[%s2259_s6 + $0x40] sm:$0xff] }
 0x16a   :  { %439 = vrot.lane.b32.xlu1 %v437_v62, %s1840_s20  ;;  %v573_v62 = vld [vmem:[%s2259_s6 + $0x50] sm:$0xff] }
 0x1d6   :  { %v240_v1 = vpop.permute.xlu1 %239 }
 0x1d7   :  { %v242_v2 = vadd.f32 %v240_v1, %v232_v63  ;;  %v576_v63 = vld [vmem:[%s2259_s6 + $0x68] sm:$0xff]  ;;  %v1695_v1 = vpack.c.bf16 %v573_v62, %v571_v61 }
 0x1d9   :  { %1766 = vtanh.f32 %v242_v2 }
 0x1dc   :  { %v440_v5 = vpop.permute.xlu1 %439 }
 0x1dd   :  { %v442_v6 = vadd.f32 %v440_v5, %v432_v3  ;;  %v676_v3 = vld [vmem:[%s2260_s7 + $0x8] sm:$0xff]  ;;  %v578_v5 = vld [vmem:[%s2259_s6 + $0x78] sm:$0xff] }
 0x1df   :  { %1768 = vtanh.f32 %v442_v6 }
 0x1e3   :  { %v1767_v7 = vpop.eup %1766 }
 0x1e4   :  { %245 = vrot.lane.b32.xlu0 %v1767_v7, %s1839_s5  ;;  %v1697_v7 = vpack.c.bf16 %v578_v5, %v576_v63 }
 0x1e9   :  { %v1769_v8 = vpop.eup %1768 }
 0x1ea   :  { %445 = vrot.lane.b32.xlu1 %v1769_v8, %s1839_s5  ;;  %v575_v8 = vld [vmem:[%s2259_s6 + $0x60] sm:$0xff] }
 0x256   :  { %v246_v9 = vpop.permute.xlu0 %245 }
 0x257   :  { %v248_v10 = vmul.f32 %v1763_v57, %v246_v9  ;;  %v577_v9 = vld [vmem:[%s2259_s6 + $0x70] sm:$0xff] }
 0x259   :  { %250 = vrot.lane.b32.xlu0 %v248_v10, %s1840_s20  ;;  %v677_v10 = vld [vmem:[%s2260_s7 + $0x10] sm:$0xff] }
 0x25c   :  { %v446_v11 = vpop.permute.xlu1 %445 }
 0x25d   :  { %v2008_v12 = vmul.f32 %v1765_v60, %v446_v11  ;;  %v1693_v60 = vpack.c.bf16 %v574_v59, %v572_v58  ;;  %v1699_v11 = vpack.c.bf16 %v577_v9, %v575_v8 }
 0x25f   :  { %450 = vrot.lane.b32.xlu1 %v2008_v12, %s1840_s20  ;;  %1694 = vmatprep.subr.bf16.mxu1 %v1693_v60 }
 0x260   :  { %1696 = vmatpush1.bf16.msra.mxu1 %v1695_v1 }
 0x261   :  { %1698 = vmatprep.subr.bf16.mxu1 %v1697_v7 }
 0x264   :  { %1700 = vmatpush1.bf16.msra.mxu1 %v1699_v11 }
 0x265   :  { %1713 = vmatprep.subr.bf16.mxu1 %v1836_v0 }
 0x2cb   :  { %v2012_v13 = vpop.permute.xlu0 %250 }
 0x2cc   :  { %1550 = vmatmul.mubr.msk.f32.vlgmr.msra.gmra.mrb[4].mxu0 %vm63_vm1, %v2012_v13 }
 0x2cd   :  { %1681 = vmatpush3.bf16.msra.mxu0 %v1958_v23  ;;  %1571 = vmatprep.mubr.msk.f32.mxu0 %vm1838_vm0, %v1837_v4 }
 0x2ce   :  { %1682 = vmatprep.subr.bf16.mxu0 %v1836_v0 }
 0x2d1   :  { %1684 = vmatpush3.bf16.msra.mxu0 %v1975_v27  ;;  %v451_v14 = vpop.permute.xlu1 %450 }
 0x2d2   :  { %1701 = vmatprep.subr.bf16.mxu0 %v1836_v0 }
 0x2d4   :  { %1572 = vmatmul.mubr.msk.f32.vlgmr.msra.gmra.mrb[6].mxu0 %vm63_vm1, %v451_v14  ;;  %v678_v14 = vld [vmem:[%s2260_s7 + $0x18] sm:$0xff] }
 0x2d5   :  { %1582 = vmatprep.mubr.msk.f32.mxu0 %vm1838_vm0, %v1837_v4 }
 0x39f   :  { %v320_v15 = vpop.f32.mrb[4].mxu0 }
 0x3a0   :  { %v324_v16 = vadd.f32 %v320_v15, %v143_v43  ;;  %v1551_v17 = vpop.f32.mrb[5].mxu0  ;;  %v1705_v15 = vpack.c.bf16 %v678_v14, %v677_v10 }
 0x3a2   :  { %1770 = vtanh.f32 %v324_v16  ;;  %v1448_v23 = vmul.f32 -1.442695, %v324_v16 }
 0x3a7   :  { %v520_v18 = vpop.f32.mrb[6].mxu0 }
 0x3a8   :  { %v524_v19 = vadd.f32 %v520_v18, %v1999_v40  ;;  %v1573_v20 = vpop.f32.mrb[7].mxu0 }
 0x3a9   :  { %v1461_v20 = vld [vmem:[%s2260_s7 + $0x20] sm:$0xff] }
 0x3aa   :  { %1772 = vtanh.f32 %v524_v19  ;;  %v1455_v24 = vmul.f32 -1.442695, %v524_v19 }
 0x3ab   :  { %1774 = vpow2.f32 %v1448_v23 }
 0x3ac   :  { %v1771_v21 = vpop.eup %1770  ;;  %1776 = vpow2.f32 %v1455_v24  ;;  %v1463_v24 = vld [vmem:[%s2260_s7 + $0x30] sm:$0xff] }
 0x3ad   :  { %334 = vrot.lane.b32.xlu1 %v1771_v21, %s1839_s5  ;;  %v1462_v21 = vld [vmem:[%s2260_s7 + $0x28] sm:$0xff] }
 0x3b4   :  { %v1773_v22 = vpop.eup %1772 }
 0x3b5   :  { %534 = vrot.lane.b32.xlu0 %v1773_v22, %s1839_s5  ;;  %v1775_v25 = vpop.eup %1774  ;;  %v2120_v22 = vpack.c.bf16 %v1462_v21, %v1461_v20 }
 0x3b6   :  { %v328_v26 = vadd.f32 1.0, %v1775_v25  ;;  %v1777_v27 = vpop.eup %1776 }
 0x3b7   :  { %v528_v28 = vadd.f32 1.0, %v1777_v27 }
 0x3b8   :  { %1778 = vrcp.f32 %v328_v26 }
 0x3b9   :  { %1780 = vrcp.f32 %v528_v28 }
 0x3c2   :  { %v2028_v31 = vpop.eup %1778 }
 0x3c3   :  { %v2032_v35 = vpop.eup %1780  ;;  %v332_v38 = vmul.f32 %v2028_v31, %v242_v2  ;;  %v675_v2 = vld [vmem:[%s2260_s7] sm:$0xff] }
 0x3c4   :  { %v532_v41 = vmul.f32 %v2032_v35, %v442_v6  ;;  %v1702_v6 = vpack.c.bf16 %v676_v3, %v675_v2 }
 0x3c6   :  { %1703 = vmatpush3.bf16.msra.mxu0 %v1702_v6 }
 0x3c7   :  { %1704 = vmatprep.subr.bf16.mxu0 %v1836_v0 }
 0x3ca   :  { %1706 = vmatpush3.bf16.msra.mxu0 %v1705_v15 }
 0x3cb   :  { %1707 = vmatprep.subr.bf16.mxu0 %v1836_v0 }
 0x3cd   :  { %1583 = vmatmul.mubr.f32.vlgmr.msra.gmra.mrb[8].mxu0 %v1837_v4 }
 0x3ce   :  { %1709 = vmatpush3.bf16.msra.mxu0 %v1702_v6  ;;  %1593 = vmatprep.mubr.msk.f32.mxu0 %vm1838_vm0, %v1837_v4 }
 0x3cf   :  { %1710 = vmatprep.subr.bf16.mxu0 %v1836_v0 }
 0x3d2   :  { %1712 = vmatpush3.bf16.msra.mxu0 %v1705_v15 }
 0x3d3   :  { %1719 = vmatprep.subr.bf16.mxu0 %v1836_v0 }
 0x41f   :  { %v335_v33 = vpop.permute.xlu1 %334 }
 0x420   :  { %v337_v34 = vmul.f32 %v2028_v31, %v335_v33 }
 0x422   :  { %339 = vrot.lane.b32.xlu1 %v337_v34, %s1840_s20  ;;  %v579_v34 = vld [vmem:[%s2261_s8] sm:$0x3] }
 0x427   :  { %v535_v36 = vpop.permute.xlu0 %534 }
 0x428   :  { %v537_v37 = vmul.f32 %v2032_v35, %v535_v36  ;;  %v588_v36 = vrot.slane %v579_v34, %v59_v32 }
 0x42a   :  { %539 = vrot.lane.b32.xlu0 %v537_v37, %s1840_s20 }
 0x494   :  { %v340_v39 = vpop.permute.xlu1 %339 }
 0x495   :  { %v342_v40 = vadd.f32 %v340_v39, %v332_v38 }
 0x497   :  { %1782 = vtanh.f32 %v342_v40 }
 0x49c   :  { %v540_v42 = vpop.permute.xlu0 %539 }
 0x49d   :  { %v542_v43 = vadd.f32 %v540_v42, %v532_v41 }
 0x49f   :  { %1784 = vtanh.f32 %v542_v43 }
 0x4a1   :  { %v1783_v44 = vpop.eup %1782 }
 0x4a2   :  { %345 = vrot.lane.b32.xlu1 %v1783_v44, %s1839_s5 }
 0x4a9   :  { %v1785_v57 = vpop.eup %1784 }
 0x4aa   :  { %545 = vrot.lane.b32.xlu0 %v1785_v57, %s1839_s5 }
 0x514   :  { %v346_v16 = vpop.permute.xlu1 %345 }
 0x515   :  { %v348_v17 = vmul.f32 %v2028_v31, %v346_v16 }
 0x517   :  { %550 = vrot.lane.b32.xlu1 %v348_v17, %s1840_s20 }
 0x51c   :  { %v546_v18 = vpop.permute.xlu0 %545 }
 0x51d   :  { %v548_v19 = vmul.f32 %v2032_v35, %v546_v18  ;;  %v584_v35 = vrot.slane %v579_v34, %v55_v30 }
 0x51f   :  { %555 = vrot.lane.b32.xlu0 %v548_v19, %s1839_s5 }
 0x523   :  { %557 = vrot.lane.b32.xlu0 %v2008_v12, %s1839_s5  ;;  %v1464_v12 = vld [vmem:[%s2260_s7 + $0x38] sm:$0xff] }
 0x524   :  { %v2133_v26 = vpack.c.bf16 %v1464_v12, %v1463_v24 }
 0x589   :  { %v551_v27 = vpop.permute.xlu1 %550 }
 0x591   :  { %v556_v23 = vpop.permute.xlu0 %555 }
 0x592   :  { %v561_v25 = vsel %vm63_vm1, %v2012_v13, %v556_v23  ;;  %v745_v13 = vpop.f32.mrb[8].mxu0 }
 0x593   :  { %1456 = vmatmul.mubr.msk.f32.vlgmr.msra.gmra.mrb[4].mxu1 %vm591_vm2, %v561_v25  ;;  %v1584_v33 = vpop.f32.mrb[9].mxu0 }
 0x594   :  { %1715 = vmatpush3.bf16.msra.mxu1 %v2120_v22  ;;  %668 = vmatprep.mubr.f32.mxu1 %v1837_v4 }
 0x595   :  { %v558_v28 = vpop.permute.xlu0 %557  ;;  %1716 = vmatprep.subr.bf16.mxu1 %v1836_v0 }
 0x596   :  { %v562_v31 = vsel %vm63_vm1, %v551_v27, %v558_v28 }
 0x597   :  { %1457 = vmatmul.mubr.msk.f32.gmra.mrb[6].mxu1 %vm591_vm2, %v562_v31 }
 0x598   :  { %1718 = vmatpush3.bf16.msra.mxu1 %v2133_v26  ;;  %1604 = vmatprep.mubr.msk.f32.mxu1 %vm1838_vm0, %v1837_v4 }
 0x59b   :  { %1605 = vmatmul.mubr.f32.vlgmr.msra.gmra.mrb[8].mxu1 %v1837_v4 }
 0x666   :  { %v664_v37 = vpop.f32.mrb[4].mxu1 }
 0x667   :  { %v665_v38 = vadd.f32 %v664_v37, %v584_v35  ;;  %v666_v39 = vpop.f32.mrb[5].mxu1 }
 0x668   :  { %v2149_v40 = vadd.f32 %v666_v39, %v588_v36 }
 0x669   :  { %v749_v41 = vadd.f32 %v745_v13, %v665_v38 }
 0x66a   :  { %v670_v42 = vpop.f32.mrb[6].mxu1 }
 0x66b   :  { %1786 = vtanh.f32 %v749_v41  ;;  %v671_v43 = vadd.f32 %v670_v42, %v584_v35  ;;  %v672_v44 = vpop.f32.mrb[7].mxu1  ;;  %v1458_v30 = vmul.f32 -1.442695, %v749_v41  ;;  %v1088_v42 = vld [vmem:[%s2262_s9] sm:$0xff] }
 0x66c   :  { %v673_v45 = vadd.f32 %v672_v44, %v588_v36 }
 0x66e   :  { %v945_v46 = vpop.f32.mrb[8].mxu1 }
 0x66f   :  { %v949_v47 = vadd.f32 %v945_v46, %v673_v45  ;;  %v1606_v48 = vpop.f32.mrb[9].mxu1  ;;  %v1090_v46 = vld [vmem:[%s2262_s9 + $0x10] sm:$0xff] }
 0x671   :  { %1788 = vtanh.f32 %v949_v47  ;;  %v1465_v32 = vmul.f32 -1.442695, %v949_v47  ;;  %v1091_v47 = vld [vmem:[%s2262_s9 + $0x18] sm:$0xff] }
 0x672   :  { %1790 = vpow2.f32 %v1458_v30  ;;  %v1729_v48 = vpack.c.bf16 %v1091_v47, %v1090_v46 }
 0x673   :  { %1792 = vpow2.f32 %v1465_v32  ;;  %v1094_v32 = vld [vmem:[%s2262_s9 + $0x30] sm:$0xff] }
 0x675   :  { %v1787_v49 = vpop.eup %1786 }
 0x676   :  { %759 = vrot.lane.b32.xlu1 %v1787_v49, %s1839_s5  ;;  %v1092_v49 = vld [vmem:[%s2262_s9 + $0x20] sm:$0xff] }
 0x67b   :  { %v1789_v29 = vpop.eup %1788 }
 0x67c   :  { %959 = vrot.lane.b32.xlu0 %v1789_v29, %s1839_s5  ;;  %v1791_v50 = vpop.eup %1790  ;;  %v1093_v29 = vld [vmem:[%s2262_s9 + $0x28] sm:$0xff] }
 0x67d   :  { %v753_v51 = vadd.f32 1.0, %v1791_v50  ;;  %v1793_v52 = vpop.eup %1792  ;;  %v1733_v30 = vpack.c.bf16 %v1093_v29, %v1092_v49  ;;  %v1095_v50 = vld [vmem:[%s2262_s9 + $0x38] sm:$0xff] }
 0x67e   :  { %v953_v53 = vadd.f32 1.0, %v1793_v52 }
 0x67f   :  { %1794 = vrcp.f32 %v753_v51  ;;  %v1737_v51 = vpack.c.bf16 %v1095_v50, %v1094_v32 }
 0x680   :  { %1796 = vrcp.f32 %v953_v53 }
 0x689   :  { %v1795_v54 = vpop.eup %1794 }
 0x68a   :  { %v1797_v57 = vpop.eup %1796  ;;  %v757_v60 = vmul.f32 0.0, %v1795_v54 }
 0x68b   :  { %v957_v63 = vmul.f32 0.0, %v1797_v57 }
 0x6e8   :  { %v760_v55 = vpop.permute.xlu1 %759 }
 0x6e9   :  { %v762_v56 = vmul.f32 %v1795_v54, %v760_v55  ;;  %v1269_v55 = vld [vmem:[%s2263_s2 + $0x8] sm:$0xff] }
 0x6eb   :  { %764 = vrot.lane.b32.xlu1 %v762_v56, %s1840_s20 }
 0x6ee   :  { %v960_v58 = vpop.permute.xlu0 %959 }
 0x6ef   :  { %v962_v59 = vmul.f32 %v1797_v57, %v960_v58  ;;  %v1271_v58 = vld [vmem:[%s2263_s2 + $0x18] sm:$0xff] }
 0x6f1   :  { %964 = vrot.lane.b32.xlu0 %v962_v59, %s1840_s20 }
 0x75d   :  { %v765_v61 = vpop.permute.xlu1 %764 }
 0x75e   :  { %v767_v62 = vadd.f32 %v765_v61, %v757_v60  ;;  %v1267_v61 = vld [vmem:[%s2264_s11] sm:$0xff] }
 0x760   :  { %1798 = vtanh.f32 %v767_v62 }
 0x763   :  { %v965_v1 = vpop.permute.xlu0 %964 }
 0x764   :  { %v967_v2 = vadd.f32 %v965_v1, %v957_v63 }
 0x766   :  { %1800 = vtanh.f32 %v967_v2 }
 0x76a   :  { %v1799_v3 = vpop.eup %1798 }
 0x76b   :  { %770 = vrot.lane.b32.xlu1 %v1799_v3, %s1839_s5 }
 0x770   :  { %v1801_v5 = vpop.eup %1800 }
 0x771   :  { %970 = vrot.lane.b32.xlu0 %v1801_v5, %s1839_s5 }
 0x7dd   :  { %v771_v6 = vpop.permute.xlu1 %770 }
 0x7de   :  { %v773_v7 = vmul.f32 %v1795_v54, %v771_v6  ;;  %v1268_v54 = vld [vmem:[%s2263_s2] sm:$0xff] }
 0x7df   :  { %v1742_v56 = vpack.c.bf16 %v1269_v55, %v1268_v54 }
 0x7e0   :  { %775 = vrot.lane.b32.xlu1 %v773_v7, %s1840_s20 }
 0x7e3   :  { %v971_v8 = vpop.permute.xlu0 %970 }
 0x7e4   :  { %v2158_v9 = vmul.f32 %v1797_v57, %v971_v8  ;;  %v1270_v57 = vld [vmem:[%s2263_s2 + $0x10] sm:$0xff] }
 0x7e5   :  { %v1745_v59 = vpack.c.bf16 %v1271_v58, %v1270_v57 }
 0x7e6   :  { %975 = vrot.lane.b32.xlu0 %v2158_v9, %s1840_s20 }
 0x852   :  { %v2162_v10 = vpop.permute.xlu1 %775 }
 0x853   :  { %1594 = vmatmul.mubr.msk.f32.vlgmr.msra.gmra.mrb[10].mxu0 %vm63_vm1, %v2162_v10 }
 0x854   :  { %1721 = vmatpush3.bf16.msra.mxu0 %v2120_v22  ;;  %1615 = vmatprep.mubr.msk.f32.mxu0 %vm1838_vm0, %v1837_v4 }
 0x855   :  { %1722 = vmatprep.subr.bf16.mxu0 %v1836_v0 }
 0x858   :  { %1724 = vmatpush3.bf16.msra.mxu0 %v2133_v26  ;;  %v976_v11 = vpop.permute.xlu0 %975 }
 0x859   :  { %1741 = vmatprep.subr.bf16.mxu0 %v1836_v0 }
 0x85b   :  { %1616 = vmatmul.mubr.msk.f32.vlgmr.msra.gmra.mrb[12].mxu0 %vm63_vm1, %v976_v11 }
 0x85c   :  { %1645 = vmatprep.mubr.msk.f32.mxu0 %vm1838_vm0, %v1837_v4  ;;  %1743 = vmatpush3.bf16.msra.mxu0 %v1742_v56 }
 0x85d   :  { %1744 = vmatprep.subr.bf16.mxu0 %v1836_v0 }
 0x860   :  { %1746 = vmatpush3.bf16.msra.mxu0 %v1745_v59 }
 0x861   :  { %1648 = vmatprep.subr.mxu0 %v1837_v4 }
 0x863   :  { %1646 = vmatmul.mubr.msk.f32.vlgmr.msra.gmra.mrb[14].mxu0 %vm63_vm1, %v1267_v61 }
 0x864   :  { %1650 = vmatprep.mubr.msk.f32.mxu0 %vm1838_vm0, %v1837_v4  ;;  %v1468_v4 = vld [vmem:[%s2265_s10] ss:$0 sm:$0xff]  ;;  %s1841_s10 = smov 8  }
 0x926   :  { %v845_v14 = vpop.f32.mrb[10].mxu0 }
 0x927   :  { %v849_v15 = vadd.f32 %v845_v14, %v671_v43  ;;  %v1595_v16 = vpop.f32.mrb[11].mxu0  ;;  %v1089_v43 = vld [vmem:[%s2262_s9 + $0x8] sm:$0xff] }
 0x928   :  { %v1725_v44 = vpack.c.bf16 %v1089_v43, %v1088_v42 }
 0x929   :  { %1802 = vtanh.f32 %v849_v15  ;;  %v1460_v22 = vmul.f32 -1.442695, %v849_v15 }
 0x92a   :  { %1726 = vmatprep.subr.bf16.mxu1 %v1725_v44 }
 0x92b   :  { %1728 = vmatpush3.bf16.msra.mxu1 %v1725_v44 }
 0x92c   :  { %1730 = vmatprep.subr.bf16.mxu1 %v1729_v48 }
 0x92e   :  { %v1045_v17 = vpop.f32.mrb[12].mxu0 }
 0x92f   :  { %v1049_v18 = vadd.f32 %v1045_v17, %v2149_v40  ;;  %v1617_v19 = vpop.f32.mrb[13].mxu0  ;;  %1732 = vmatpush3.bf16.msra.mxu1 %v1729_v48 }
 0x930   :  { %1734 = vmatprep.subr.bf16.mxu1 %v1733_v30 }
 0x931   :  { %1804 = vtanh.f32 %v1049_v18  ;;  %v1467_v23 = vmul.f32 -1.442695, %v1049_v18 }
 0x932   :  { %1806 = vpow2.f32 %v1460_v22 }
 0x933   :  { %v1803_v20 = vpop.eup %1802  ;;  %1808 = vpow2.f32 %v1467_v23  ;;  %1736 = vmatpush3.bf16.msra.mxu1 %v1733_v30 }
 0x934   :  { %859 = vrot.lane.b32.xlu0 %v1803_v20, %s1839_s5  ;;  %1738 = vmatprep.subr.bf16.mxu1 %v1737_v51 }
 0x936   :  { %v1341_v5 = vpop.f32.mrb[14].mxu0 }
 0x937   :  { %1740 = vmatpush3.bf16.msra.mxu1 %v1737_v51  ;;  %v1647_v6 = vpop.f32.mrb[15].mxu0 }
 0x93b   :  { %v1805_v21 = vpop.eup %1804 }
 0x93c   :  { %1059 = vrot.lane.b32.xlu1 %v1805_v21, %s1839_s5  ;;  %v1807_v24 = vpop.eup %1806 }
 0x93d   :  { %v853_v12 = vadd.f32 1.0, %v1807_v24  ;;  %v1809_v25 = vpop.eup %1808 }
 0x93e   :  { %v1053_v26 = vadd.f32 1.0, %v1809_v25 }
 0x93f   :  { %1810 = vrcp.f32 %v853_v12 }
 0x940   :  { %1812 = vrcp.f32 %v1053_v26 }
 0x949   :  { %v1811_v27 = vpop.eup %1810 }
 0x94a   :  { %v1813_v13 = vpop.eup %1812  ;;  %v857_v35 = vmul.f32 %v1811_v27, %v767_v62 }
 0x94b   :  { %v1057_v38 = vmul.f32 %v1813_v13, %v967_v2 }
 0x9a6   :  { %v860_v28 = vpop.permute.xlu0 %859 }
 0x9a7   :  { %v862_v31 = vmul.f32 %v1811_v27, %v860_v28 }
 0x9a9   :  { %864 = vrot.lane.b32.xlu0 %v862_v31, %s1840_s20 }
 0x9ae   :  { %v1060_v33 = vpop.permute.xlu1 %1059 }
 0x9af   :  { %v1062_v34 = vmul.f32 %v1813_v13, %v1060_v33 }
 0x9b1   :  { %1064 = vrot.lane.b32.xlu1 %v1062_v34, %s1840_s20 }
 0xa1b   :  { %v865_v36 = vpop.permute.xlu0 %864 }
 0xa1c   :  { %v867_v37 = vadd.f32 %v865_v36, %v857_v35 }
 0xa1e   :  { %1814 = vtanh.f32 %v867_v37 }
 0xa23   :  { %v1065_v39 = vpop.permute.xlu1 %1064 }
 0xa24   :  { %v1067_v40 = vadd.f32 %v1065_v39, %v1057_v38 }
 0xa26   :  { %1816 = vtanh.f32 %v1067_v40 }
 0xa28   :  { %v1815_v41 = vpop.eup %1814 }
 0xa29   :  { %870 = vrot.lane.b32.xlu0 %v1815_v41, %s1839_s5 }
 0xa30   :  { %v1817_v45 = vpop.eup %1816 }
 0xa31   :  { %1070 = vrot.lane.b32.xlu1 %v1817_v45, %s1839_s5 }
 0xa9b   :  { %v871_v52 = vpop.permute.xlu0 %870 }
 0xa9c   :  { %v873_v53 = vmul.f32 %v1811_v27, %v871_v52 }
 0xa9e   :  { %1075 = vrot.lane.b32.xlu0 %v873_v53, %s1840_s20 }
 0xaa3   :  { %v1071_v60 = vpop.permute.xlu1 %1070 }
 0xaa4   :  { %v1073_v62 = vmul.f32 %v1813_v13, %v1071_v60 }
 0xaa6   :  { %1080 = vrot.lane.b32.xlu1 %v1073_v62, %s1839_s5 }
 0xaaa   :  { %1082 = vrot.lane.b32.xlu1 %v2158_v9, %s1839_s5  ;;  %s1842_s5 = smov 120  }
 0xb10   :  { %v1076_v1 = vpop.permute.xlu0 %1075 }
 0xb18   :  { %v1081_v0 = vpop.permute.xlu1 %1080 }
 0xb19   :  { %v1086_v63 = vsel %vm63_vm1, %v2162_v10, %v1081_v0 }
 0xb1a   :  { %1634 = vmatprep.mubr.msk.f32.mxu1 %vm591_vm2, %v1086_v63 }
 0xb1c   :  { %v1083_v2 = vpop.permute.xlu1 %1082 }
 0xb1d   :  { %v1087_v3 = vsel %vm63_vm1, %v1076_v1, %v1083_v2 }
 0xb1e   :  { %1635 = vmatmul.mubr.msk.f32.vlgmr.msra.gmra.mrb[10].mxu1 %vm591_vm2, %v1087_v3 }
 0xbf1   :  { %v1636_v7 = vpop.f32.mrb[10].mxu1 }
 0xbf2   :  { %v1181_v8 = vadd.f32 %v1636_v7, %v1468_v4  ;;  %v1175_v9 = vpop.f32.mrb[11].mxu1 }
 0xbf3   :  { %v1176_v11 = vadd.f32 %v1468_v4, %v1175_v9  ;;  %v1429_v9 = vld [vmem:[%s2266_s1] sm:$0x3] }
 0xbf4   :  { %v1188_v10 = vsel %vm1184_vm3, %v1181_v8, -inf  ;;  %v1210_v31 = vmul.f32 %v1181_v8, %v1181_v8  ;;  %v1223_v33 = vmul.f32 1.442695, %v1181_v8  ;;  %v1208_v42 = vadd.f32 1.0, %v1181_v8 }
 0xbf5   :  { %1189 = vmax.xlane.f32.xlu1 %v1188_v10  ;;  %v1185_v14 = vsel %vm1184_vm3, %v1176_v11, -inf  ;;  %v1209_v28 = vmul.f32 %v1176_v11, %v1176_v11  ;;  %v1221_v13 = vmul.f32 1.442695, %v1176_v11  ;;  %v1207_v36 = vadd.f32 1.0, %v1176_v11 }
 0xbf6   :  { %1186 = vmax.xlane.f32.xlu0 %v1185_v14 }
 0xbfa   :  { %1345 = vmax.xlane.f32.xlu0 %v1341_v5 }
 0xc82   :  { %v1190_v15 = vpop.xlane.xlu1 %1189 }
 0xc83   :  { %v1192_v16 = vsub.f32 %v1181_v8, %v1190_v15  ;;  %v1187_v17 = vpop.xlane.xlu0 %1186 }
 0xc84   :  { %v1191_v18 = vsub.f32 %v1176_v11, %v1187_v17 }
 0xc85   :  { %v1195_v19 = vmul.f32 1.442695, %v1192_v16 }
 0xc86   :  { %v1193_v20 = vmul.f32 1.442695, %v1191_v18 }
 0xc87   :  { %1818 = vpow2.f32 %v1195_v19  ;;  %v1346_v21 = vpop.xlane.xlu0 %1345 }
 0xc88   :  { %1820 = vpow2.f32 %v1193_v20  ;;  %v1347_v22 = vsub.f32 %v1341_v5, %v1346_v21 }
 0xc8a   :  { %v1348_v23 = vmul.f32 1.442695, %v1347_v22 }
 0xc8c   :  { %1822 = vpow2.f32 %v1348_v23 }
 0xc8d   :  { %1824 = vpow2.f32 %v1221_v13 }
 0xc8e   :  { %1826 = vpow2.f32 %v1223_v33 }
 0xc91   :  { %v1819_v24 = vpop.eup %1818 }
 0xc92   :  { %v1821_v12 = vpop.eup %1820  ;;  %v1200_v25 = vsel %vm1184_vm3, %v1819_v24, 0.0 }
 0xc93   :  { %1201 = vadd.xlane.f32.xlu1 %v1200_v25  ;;  %v1197_v26 = vsel %vm1184_vm3, %v1821_v12, 0.0 }
 0xc94   :  { %1198 = vadd.xlane.f32.xlu0 %v1197_v26 }
 0xc96   :  { %v1823_v27 = vpop.eup %1822 }
 0xc97   :  { %v1825_v40 = vpop.eup %1824 }
 0xc98   :  { %1350 = vadd.xlane.f32.xlu0 %v1823_v27  ;;  %v1827_v44 = vpop.eup %1826 }
 0xca4   :  { %1213 = vrot.lane.b32.xlu1 %v1209_v28, %s1841_s10 }
 0xcae   :  { %1215 = vrot.lane.b32.xlu0 %v1210_v31, %s1841_s10 }
 0xd20   :  { %v1202_v34 = vpop.xlane.xlu1 %1201 }
 0xd21   :  { %1828 = vrcp.f32 %v1202_v34  ;;  %v1199_v35 = vpop.xlane.xlu0 %1198 }
 0xd22   :  { %1830 = vrcp.f32 %v1199_v35 }
 0xd24   :  { %v1214_v37 = vpop.permute.xlu1 %1213 }
 0xd25   :  { %v1219_v38 = vsub.f32 %v1207_v36, %v1214_v37  ;;  %v1351_v39 = vpop.xlane.xlu0 %1350 }
 0xd26   :  { %1832 = vrcp.f32 %v1351_v39 }
 0xd27   :  { %v1225_v41 = vsub.f32 %v1219_v38, %v1825_v40 }
 0xd29   :  { %1229 = vrot.lane.b32.xlu1 %v1225_v41, %s1842_s5  ;;  %v1216_v43 = vpop.permute.xlu0 %1215 }
 0xd2a   :  { %v1220_v45 = vsub.f32 %v1208_v42, %v1216_v43 }
 0xd2b   :  { %v1829_v46 = vpop.eup %1828 }
 0xd2c   :  { %v1831_v47 = vpop.eup %1830  ;;  %v1206_v48 = vmul.f32 %v1829_v46, %v1819_v24  ;;  %v1226_v49 = vsub.f32 %v1220_v45, %v1827_v44 }
 0xd2d   :  { %v1205_v29 = vmul.f32 %v1831_v47, %v1821_v12 }
 0xd2e   :  { %v1258_v30 = vsel %vm1184_vm3, %v1206_v48, -inf  ;;  %1231 = vrot.lane.b32.xlu1 %v1226_v49, %s1842_s5 }
 0xd2f   :  { %v1259_v32 = vrot.slane %v1258_v30, 4  ;;  %v1251_v50 = vsel %vm1184_vm3, %v1205_v29, -inf }
 0xd30   :  { %v1833_v51 = vpop.eup %1832  ;;  %v1252_v52 = vrot.slane %v1251_v50, 4 }
 0xd31   :  { %v1353_v53 = vmul.f32 %v1833_v51, %v1823_v27  ;;  %v1260_v54 = vmax.f32 %v1258_v30, %v1259_v32 }
 0xd32   :  { %v1253_v55 = vmax.f32 %v1251_v50, %v1252_v52 }
 0xd33   :  { %1649 = vmatpush3.msra.mxu0 %v1353_v53  ;;  %v1261_v56 = vrot.slane %v1260_v54, 2 }
 0xd34   :  { %v1254_v57 = vrot.slane %v1253_v55, 2 }
 0xd35   :  { %v1262_v58 = vmax.f32 %v1260_v54, %v1261_v56 }
 0xd36   :  { %v1255_v59 = vmax.f32 %v1253_v55, %v1254_v57 }
 0xd37   :  { %v1263_v60 = vrot.slane %v1262_v58, 1 }
 0xd38   :  { %v1256_v61 = vrot.slane %v1255_v59, 1 }
 0xd39   :  { %v1264_v62 = vmax.f32 %v1262_v58, %v1263_v60 }
 0xd3a   :  { %v1257_v0 = vmax.f32 %v1255_v59, %v1256_v61 }
 0xd3c   :  { %v1266_v63 = vsel %vm1265_vm4, %v1257_v0, %v1264_v62 }
 0xd3d   :  { %1651 = vmatmul.mubr.msk.f32.vlgmr.msra.gmra.mrb[16].mxu0 %vm1184_vm3, %v1266_v63 }
 0xd9b   :  { %v1230_v1 = vpop.permute.xlu1 %1229 }
 0xd9c   :  { %v1235_v2 = vsel %vm1184_vm3, %v1230_v1, 0.0 }
 0xd9d   :  { %1236 = vadd.xlane.f32.xlu0 %v1235_v2 }
 0xda0   :  { %v1232_v3 = vpop.permute.xlu1 %1231 }
 0xda1   :  { %v1238_v5 = vsel %vm1184_vm3, %v1232_v3, 0.0 }
 0xda2   :  { %1239 = vadd.xlane.f32.xlu1 %v1238_v5 }
 0xe10   :  { %v1423_v6 = vpop.f32.mrb[16].mxu0 }
 0xe11   :  { %v1424_v4 = vadd.f32 1e-06, %v1423_v6  ;;  %v1652_v7 = vpop.f32.mrb[17].mxu0 }
 0xe13   :  { %1834 = vlog2.f32 %v1424_v4 }
 0xe1d   :  { %v1835_v8 = vpop.eup %1834 }
 0xe1e   :  { %v1428_v11 = vmul.f32 0.6931472, %v1835_v8 }
 0xe20   :  { %v1430_v10 = vmul.f32 %v1429_v9, %v1428_v11 }
 0xe22   :  { %v1432_v14 = vsel %vm1431_vm5, %v1430_v10, 0.0 }
 0xe23   :  { %1433 = vadd.xlane.f32.xlu0 %v1432_v14 }
 0xe2a   :  { %v1237_v16 = vpop.xlane.xlu0 %1236 }
 0xe2b   :  { %v1241_v18 = vmul.f32 -0.5, %v1237_v16 }
 0xe2f   :  { %v1240_v15 = vpop.xlane.xlu1 %1239 }
 0xe30   :  { %v1242_v17 = vmul.f32 -0.5, %v1240_v15 }
 0xe32   :  { %v1243_v19 = vadd.f32 %v1242_v17, %v1241_v18 }
 0xe34   :  { %v1244_v20 = vrot.slane %v1243_v19, 4 }
 0xe36   :  { %v1245_v21 = vadd.f32 %v1244_v20, %v1243_v19 }
 0xe38   :  { %v1246_v22 = vrot.slane %v1245_v21, 2 }
 0xe3a   :  { %v1247_v23 = vadd.f32 %v1246_v22, %v1245_v21 }
 0xe3c   :  { %v1248_v24 = vrot.slane %v1247_v23, 1 }
 0xe3e   :  { %v1249_v12 = vadd.f32 %v1248_v24, %v1247_v23 }
 0xe40   :  { %v1250_v26 = vmul.f32 0.0625, %v1249_v12 }
 0xeb0   :  { %v1434_v25 = vpop.xlane.xlu0 %1433 }
 0xeb1   :  { %v1435_v27 = vsub.f32 0.0, %v1434_v25 }
 0xeb3   :  { %v1436_v28 = vsel %vm1431_vm5, %v1435_v27, %v1250_v26 }
 0xeb4   :  { %v1438_v31 = vsel %vm1437_vm6, %v1436_v28, 0.0 }
 0xeb5   :  { %1439 = vst [vmem:[%s2267_s12] sm:$0xff] %v1438_v31 }

</bundles_post_ra>
